<compile_context>
chip_gen: v7x
topology: tpu7x:2x2x1
jax: 0.10.0
libtpu: 0.0.40
codegen_flags: <defaults>
</compile_context>

<pallas_src>
import jax
import jax.numpy as jnp
from jax.experimental import pallas as pl
from jax.experimental.pallas import tpu as pltpu


# ---------------------------------------------------------------------------
# Host-side parameter folding (tiny, trace-time; becomes XLA constants)
# ---------------------------------------------------------------------------
def _fold_bn(conv_b, gamma, beta, mean, var, eps=1e-5):
    s = gamma / jnp.sqrt(var + eps)
    shift = beta - mean * s + conv_b * s
    return s, shift


def _conv_pool_mats(w_scaled, hin, hout):
    """Band matrices A[p, dw] (transposed) for the fused conv+h-pool.

    w_scaled: (Cout, Cin, 3, 3) conv weights with BN scale folded in.
    Returns (6, Cin*hin, Cout*hout), index p*3 + dw, where
      A[p,dw][ci*hin + hh, co*hout + ho] = w[co, ci, hh - (2*ho + p) + 1, dw]
    (zero when the 3x3 tap falls outside [0, hin) -> implicit H zero-padding).
    """
    cout, cin = w_scaled.shape[0], w_scaled.shape[1]
    ho = jnp.arange(hout)[:, None]            # (hout, 1)
    hh = jnp.arange(hin)[None, :]             # (1, hin)
    mats = []
    for p in range(2):
        dh = hh - 2 * ho - p + 1              # (hout, hin)
        mask = ((dh >= 0) & (dh < 3)).astype(jnp.float32)
        dhc = jnp.clip(dh, 0, 2)
        for dw in range(3):
            wdw = w_scaled[:, :, :, dw]                     # (Cout, Cin, 3)
            t = wdw[:, :, dhc] * mask                       # (Cout, Cin, hout, hin)
            a = jnp.transpose(t, (0, 2, 1, 3)).reshape(cout * hout, cin * hin)
            mats.append(a.T)                                # (Cin*hin, Cout*hout)
    return jnp.stack(mats, axis=0).astype(jnp.float32)


def _shift_mats(n):
    """(3, n, n): P[dw] @ act shifts rows by dw-1 with zero fill (W padding)."""
    return jnp.stack([jnp.eye(n, k=dw - 1, dtype=jnp.float32) for dw in range(3)], 0)


def _pool_select(n_in):
    """(2, n_in//2, n_in): row-selection matrices picking even/odd pairs."""
    n_out = n_in // 2
    sel = []
    for p in range(2):
        m = jnp.arange(n_in)[None, :] == (2 * jnp.arange(n_out)[:, None] + p)
        sel.append(m.astype(jnp.float32))
    return jnp.stack(sel, axis=0)


def _prep_input(x_nchw):
    """(N, C, H, W) -> (N, W, C*H):  XT[n, w, c*H + h] = x[n, c, h, w]."""
    n, c, h, w = x_nchw.shape
    return jnp.transpose(x_nchw, (0, 3, 1, 2)).reshape(n, w, c * h)


# ---------------------------------------------------------------------------
# The single fused Pallas kernel (one image per grid step)
# ---------------------------------------------------------------------------
def _fused_forward_kernel(x_ref, p1_ref, a1_ref, sh1_ref, e1_ref,
                          p2_ref, a2_ref, sh2_ref, e2_ref,
                          wfc_ref, bfc_ref, wada_ref, bada_ref, o_ref):
    f32 = jnp.float32

    def conv_bn_pool_relu(act, p_ref, a_ref, sh_ref, e_ref):
        # act: (Wc, Cin*Hc)  ->  (Wc//2, Cout*(Hc//2))
        shifted = [jnp.dot(p_ref[dw], act, preferred_element_type=f32)
                   for dw in range(3)]
        y_even = sh_ref[...]          # (1, Cout*Ho): BN shift (+conv bias)
        y_odd = sh_ref[...]
        for dw in range(3):
            y_even = y_even + jnp.dot(shifted[dw], a_ref[dw],
                                      preferred_element_type=f32)
            y_odd = y_odd + jnp.dot(shifted[dw], a_ref[3 + dw],
                                    preferred_element_type=f32)
        h_pooled = jnp.maximum(y_even, y_odd)          # 2x2 pool, h direction
        w_pooled = jnp.maximum(                        # 2x2 pool, w direction
            jnp.dot(e_ref[0], h_pooled, preferred_element_type=f32),
            jnp.dot(e_ref[1], h_pooled, preferred_element_type=f32))
        return jnp.maximum(w_pooled, 0.0)              # relu

    act = x_ref[0]                                     # (W, Cin*H)
    act = conv_bn_pool_relu(act, p1_ref, a1_ref, sh1_ref, e1_ref)  # (W/2, C1*H/2)
    act = conv_bn_pool_relu(act, p2_ref, a2_ref, sh2_ref, e2_ref)  # (W/4, C2*H/4)

    # flatten (torch NCHW flatten order) + fc1 + relu (dequant = identity)
    hid = bfc_ref[...]                                 # (1, hidden)
    for k in range(act.shape[0]):                      # W/4 static rows
        hid = hid + jnp.dot(act[k:k + 1, :], wfc_ref[k],
                            preferred_element_type=f32)
    hid = jnp.maximum(hid, 0.0)

    # adapter Linear
    out = jnp.dot(hid, wada_ref[...], preferred_element_type=f32) + bada_ref[...]
    o_ref[0] = out                                     # (1, n_classes)


# ---------------------------------------------------------------------------
# Full forward
# ---------------------------------------------------------------------------
def tinyml_forward(x_nchw, params):
    x_nchw = x_nchw.astype(jnp.float32)
    N, Cin, H, W = x_nchw.shape
    C1 = params["conv1_w"].shape[0]
    C2 = params["conv2_w"].shape[0]
    H2, W2 = H // 2, W // 2
    H4, W4 = H // 4, W // 4
    hidden = params["fc1_w"].shape[0]
    ncls = params["ada_w"].shape[0]

    # ---- fold BN into the conv band matrices (scale) and a row shift -------
    s1, b1 = _fold_bn(params["conv1_b"], params["bn1_gamma"], params["bn1_beta"],
                      params["bn1_mean"], params["bn1_var"])
    s2, b2 = _fold_bn(params["conv2_b"], params["bn2_gamma"], params["bn2_beta"],
                      params["bn2_mean"], params["bn2_var"])
    a1 = _conv_pool_mats(params["conv1_w"] * s1[:, None, None, None], H, H2)
    a2 = _conv_pool_mats(params["conv2_w"] * s2[:, None, None, None], H2, H4)
    sh1 = jnp.repeat(b1, H2)[None, :].astype(jnp.float32)   # (1, C1*H2)
    sh2 = jnp.repeat(b2, H4)[None, :].astype(jnp.float32)   # (1, C2*H4)
    p1, p2 = _shift_mats(W), _shift_mats(W2)                 # W-shift matrices
    e1, e2 = _pool_select(W), _pool_select(W2)               # W-pool selectors

    # ---- fc / adapter weights in the in-kernel layout ----------------------
    # flat[f] = act[w4, r] with f = r*W4 + w4  (== torch NCHW flatten order)
    wfc = jnp.transpose(params["fc1_w"].reshape(hidden, C2 * H4, W4),
                        (2, 1, 0)).astype(jnp.float32)        # (W4, C2*H4, hidden)
    bfc = params["fc1_b"][None, :].astype(jnp.float32)        # (1, hidden)
    wada = params["ada_w"].T.astype(jnp.float32)              # (hidden, ncls)
    bada = params["ada_b"][None, :].astype(jnp.float32)       # (1, ncls)

    xt = _prep_input(x_nchw)                                  # (N, W, Cin*H)

    # ---- cost estimate (dots only; helps XLA overlap the host folding) -----
    flops_per_img = 2 * (
        3 * W * W * (Cin * H) + 6 * W * (Cin * H) * (C1 * H2)
        + 2 * W2 * W * (C1 * H2)
        + 3 * W2 * W2 * (C1 * H2) + 6 * W2 * (C1 * H2) * (C2 * H4)
        + 2 * W4 * W2 * (C2 * H4)
        + W4 * (C2 * H4) * hidden + hidden * ncls)
    operands = (xt, p1, a1, sh1, e1, p2, a2, sh2, e2, wfc, bfc, wada, bada)
    bytes_accessed = sum(int(o.size) * 4 for o in operands) + N * ncls * 4

    out = pl.pallas_call(
        _fused_forward_kernel,
        out_shape=jax.ShapeDtypeStruct((N, 1, ncls), jnp.float32),
        grid=(N,),
        in_specs=[
            pl.BlockSpec((1, W, Cin * H), lambda n: (n, 0, 0)),
            pl.BlockSpec(p1.shape, lambda n: (0, 0, 0)),
            pl.BlockSpec(a1.shape, lambda n: (0, 0, 0)),
            pl.BlockSpec(sh1.shape, lambda n: (0, 0)),
            pl.BlockSpec(e1.shape, lambda n: (0, 0, 0)),
            pl.BlockSpec(p2.shape, lambda n: (0, 0, 0)),
            pl.BlockSpec(a2.shape, lambda n: (0, 0, 0)),
            pl.BlockSpec(sh2.shape, lambda n: (0, 0)),
            pl.BlockSpec(e2.shape, lambda n: (0, 0, 0)),
            pl.BlockSpec(wfc.shape, lambda n: (0, 0, 0)),
            pl.BlockSpec(bfc.shape, lambda n: (0, 0)),
            pl.BlockSpec(wada.shape, lambda n: (0, 0)),
            pl.BlockSpec(bada.shape, lambda n: (0, 0)),
        ],
        out_specs=pl.BlockSpec((1, 1, ncls), lambda n: (n, 0, 0)),
        compiler_params=pltpu.CompilerParams(
            dimension_semantics=("parallel",)),
        cost_estimate=pl.CostEstimate(flops=N * flops_per_img,
                                      transcendentals=0,
                                      bytes_accessed=bytes_accessed),
    )(*operands)
    return out.reshape(N, ncls)


# ---------------------------------------------------------------------------
# Pure-JAX reference (for a loose numerical sanity check)
# ---------------------------------------------------------------------------
def _reference_forward(x, params, eps=1e-5):
    def conv(x, w, b):
        y = jax.lax.conv_general_dilated(
            x, w, window_strides=(1, 1), padding="SAME",
            dimension_numbers=("NCHW", "OIHW", "NCHW"))
        return y + b[None, :, None, None]

    def bn(x, g, b, m, v):
        s = (g / jnp.sqrt(v + eps))[None, :, None, None]
        return (x - m[None, :, None, None]) * s + b[None, :, None, None]

    def pool(x):
        return jax.lax.reduce_window(x, -jnp.inf, jax.lax.max,
                                     (1, 1, 2, 2), (1, 1, 2, 2), "VALID")

    y = jax.nn.relu(pool(bn(conv(x, params["conv1_w"], params["conv1_b"]),
                            params["bn1_gamma"], params["bn1_beta"],
                            params["bn1_mean"], params["bn1_var"])))
    y = jax.nn.relu(pool(bn(conv(y, params["conv2_w"], params["conv2_b"]),
                            params["bn2_gamma"], params["bn2_beta"],
                            params["bn2_mean"], params["bn2_var"])))
    y = y.reshape(y.shape[0], -1)
    y = jax.nn.relu(y @ params["fc1_w"].T + params["fc1_b"])
    return y @ params["ada_w"].T + params["ada_b"]


# ---------------------------------------------------------------------------
# Deterministic synthetic parameters
# ---------------------------------------------------------------------------
def make_params(cin=4, c1=8, c2=16, hw=16, hidden=32, n_classes=10):
    k = jax.random.PRNGKey(42)
    ks = jax.random.split(k, 12)
    fc_in = c2 * (hw // 4) * (hw // 4)
    params = {
        "conv1_w": 0.1 * jax.random.normal(ks[0], (c1, cin, 3, 3), jnp.float32),
        "conv1_b": 0.1 * jax.random.normal(ks[1], (c1,), jnp.float32),
        "bn1_gamma": 1.0 + 0.1 * jax.random.normal(ks[2], (c1,), jnp.float32),
        "bn1_beta": 0.1 * jax.random.normal(ks[3], (c1,), jnp.float32),
        "bn1_mean": 0.05 * jax.random.normal(ks[4], (c1,), jnp.float32),
        "bn1_var": 1.0 + 0.1 * jnp.abs(jax.random.normal(ks[5], (c1,), jnp.float32)),
        "conv2_w": 0.1 * jax.random.normal(ks[6], (c2, c1, 3, 3), jnp.float32),
        "conv2_b": 0.1 * jax.random.normal(ks[7], (c2,), jnp.float32),
        "bn2_gamma": 1.0 + 0.1 * jax.random.normal(ks[8], (c2,), jnp.float32),
        "bn2_beta": 0.1 * jax.random.normal(ks[9], (c2,), jnp.float32),
        "bn2_mean": 0.05 * jax.random.normal(ks[10], (c2,), jnp.float32),
        "bn2_var": 1.0 + 0.1 * jnp.abs(jax.random.normal(ks[11], (c2,), jnp.float32)),
    }
    k2 = jax.random.PRNGKey(7)
    ka, kb, kc, kd = jax.random.split(k2, 4)
    params["fc1_w"] = 0.05 * jax.random.normal(ka, (hidden, fc_in), jnp.float32)
    params["fc1_b"] = 0.05 * jax.random.normal(kb, (hidden,), jnp.float32)
    params["ada_w"] = 0.05 * jax.random.normal(kc, (n_classes, hidden), jnp.float32)
    params["ada_b"] = 0.05 * jax.random.normal(kd, (n_classes,), jnp.float32)
    return params


if __name__ == "__main__":
    params = make_params(cin=4, c1=8, c2=16, hw=16, hidden=32, n_classes=10)
    x = jax.random.normal(jax.random.PRNGKey(0), (2, 4, 16, 16), jnp.float32)  # NCHW

    fwd = jax.jit(tinyml_forward)
    out = jax.block_until_ready(fwd(x, params))
    assert out.shape == (2, 10), out.shape
    assert bool(jnp.all(jnp.isfinite(out)))

    ref = jax.block_until_ready(_reference_forward(x, params))
    assert jnp.allclose(out, ref, atol=2e-2, rtol=2e-2), (out, ref)

    print("KERNEL_OK")
</pallas_src>

<mosaic_0001>
module attributes {stable_mosaic.version = 11 : i64} {
  func.func @_fused_forward_kernel(%arg0: i32, %arg1: memref<1x16x64xf32, #tpu.memory_space<vmem>>, %arg2: memref<3x16x16xf32, #tpu.memory_space<vmem>>, %arg3: memref<6x64x64xf32, #tpu.memory_space<vmem>>, %arg4: memref<1x64xf32, #tpu.memory_space<vmem>>, %arg5: memref<2x8x16xf32, #tpu.memory_space<vmem>>, %arg6: memref<3x8x8xf32, #tpu.memory_space<vmem>>, %arg7: memref<6x64x64xf32, #tpu.memory_space<vmem>>, %arg8: memref<1x64xf32, #tpu.memory_space<vmem>>, %arg9: memref<2x4x8xf32, #tpu.memory_space<vmem>>, %arg10: memref<4x64x32xf32, #tpu.memory_space<vmem>>, %arg11: memref<1x32xf32, #tpu.memory_space<vmem>>, %arg12: memref<32x10xf32, #tpu.memory_space<vmem>>, %arg13: memref<1x10xf32, #tpu.memory_space<vmem>>, %arg14: memref<1x1x10xf32, #tpu.memory_space<vmem>>) attributes {dimension_semantics = [#tpu.dimension_semantics<parallel>], iteration_bounds = array<i64: 2>, scalar_prefetch = 0 : i64, scratch_operands = 0 : i64, tpu.core_type = #tpu.core_type<tc>, window_params = [{transform_indices = @transform_0, window_bounds = array<i64: 1, 16, 64>}, {pipeline_mode = #tpu.pipeline_mode<synchronous>, transform_indices = @transform_1, window_bounds = array<i64: 3, 16, 16>}, {pipeline_mode = #tpu.pipeline_mode<synchronous>, transform_indices = @transform_2, window_bounds = array<i64: 6, 64, 64>}, {pipeline_mode = #tpu.pipeline_mode<synchronous>, transform_indices = @transform_3, window_bounds = array<i64: 1, 64>}, {pipeline_mode = #tpu.pipeline_mode<synchronous>, transform_indices = @transform_4, window_bounds = array<i64: 2, 8, 16>}, {pipeline_mode = #tpu.pipeline_mode<synchronous>, transform_indices = @transform_5, window_bounds = array<i64: 3, 8, 8>}, {pipeline_mode = #tpu.pipeline_mode<synchronous>, transform_indices = @transform_6, window_bounds = array<i64: 6, 64, 64>}, {pipeline_mode = #tpu.pipeline_mode<synchronous>, transform_indices = @transform_7, window_bounds = array<i64: 1, 64>}, {pipeline_mode = #tpu.pipeline_mode<synchronous>, transform_indices = @transform_8, window_bounds = array<i64: 2, 4, 8>}, {pipeline_mode = #tpu.pipeline_mode<synchronous>, transform_indices = @transform_9, window_bounds = array<i64: 4, 64, 32>}, {pipeline_mode = #tpu.pipeline_mode<synchronous>, transform_indices = @transform_10, window_bounds = array<i64: 1, 32>}, {pipeline_mode = #tpu.pipeline_mode<synchronous>, transform_indices = @transform_11, window_bounds = array<i64: 32, 10>}, {pipeline_mode = #tpu.pipeline_mode<synchronous>, transform_indices = @transform_12, window_bounds = array<i64: 1, 10>}, {transform_indices = @transform_13, window_bounds = array<i64: 1, 1, 10>}]} {
    %c0 = arith.constant 0 : index
    %c0_0 = arith.constant 0 : index
    %c0_1 = arith.constant 0 : index
    %0 = vector.load %arg1[%c0, %c0_0, %c0_1] : memref<1x16x64xf32, #tpu.memory_space<vmem>>, vector<1x16x64xf32>
    %1 = vector.shape_cast %0 : vector<1x16x64xf32> to vector<16x64xf32>
    %c0_2 = arith.constant 0 : index
    %c0_3 = arith.constant 0 : index
    %c0_4 = arith.constant 0 : index
    %2 = vector.load %arg2[%c0_2, %c0_3, %c0_4] : memref<3x16x16xf32, #tpu.memory_space<vmem>>, vector<1x16x16xf32>
    %3 = vector.shape_cast %2 : vector<1x16x16xf32> to vector<16x16xf32>
    %cst = arith.constant dense<0.000000e+00> : vector<16x64xf32>
    %4 = tpu.matmul %3, %1, %cst {dimension_numbers = #tpu.dot_dimension_numbers<[1], [0], [0], [1], [0, 0, 1, 1], [], []>} : vector<16x16xf32>, vector<16x64xf32>, vector<16x64xf32> -> vector<16x64xf32>
    %c1 = arith.constant 1 : index
    %c0_5 = arith.constant 0 : index
    %c0_6 = arith.constant 0 : index
    %5 = vector.load %arg2[%c1, %c0_5, %c0_6] : memref<3x16x16xf32, #tpu.memory_space<vmem>>, vector<1x16x16xf32>
    %6 = vector.shape_cast %5 : vector<1x16x16xf32> to vector<16x16xf32>
    %cst_7 = arith.constant dense<0.000000e+00> : vector<16x64xf32>
    %7 = tpu.matmul %6, %1, %cst_7 {dimension_numbers = #tpu.dot_dimension_numbers<[1], [0], [0], [1], [0, 0, 1, 1], [], []>} : vector<16x16xf32>, vector<16x64xf32>, vector<16x64xf32> -> vector<16x64xf32>
    %c2 = arith.constant 2 : index
    %c0_8 = arith.constant 0 : index
    %c0_9 = arith.constant 0 : index
    %8 = vector.load %arg2[%c2, %c0_8, %c0_9] : memref<3x16x16xf32, #tpu.memory_space<vmem>>, vector<1x16x16xf32>
    %9 = vector.shape_cast %8 : vector<1x16x16xf32> to vector<16x16xf32>
    %cst_10 = arith.constant dense<0.000000e+00> : vector<16x64xf32>
    %10 = tpu.matmul %9, %1, %cst_10 {dimension_numbers = #tpu.dot_dimension_numbers<[1], [0], [0], [1], [0, 0, 1, 1], [], []>} : vector<16x16xf32>, vector<16x64xf32>, vector<16x64xf32> -> vector<16x64xf32>
    %c0_11 = arith.constant 0 : index
    %c0_12 = arith.constant 0 : index
    %11 = vector.load %arg4[%c0_11, %c0_12] : memref<1x64xf32, #tpu.memory_space<vmem>>, vector<1x64xf32>
    %c0_13 = arith.constant 0 : index
    %c0_14 = arith.constant 0 : index
    %12 = vector.load %arg4[%c0_13, %c0_14] : memref<1x64xf32, #tpu.memory_space<vmem>>, vector<1x64xf32>
    %c0_15 = arith.constant 0 : index
    %c0_16 = arith.constant 0 : index
    %c0_17 = arith.constant 0 : index
    %13 = vector.load %arg3[%c0_15, %c0_16, %c0_17] : memref<6x64x64xf32, #tpu.memory_space<vmem>>, vector<1x64x64xf32>
    %14 = vector.shape_cast %13 : vector<1x64x64xf32> to vector<64x64xf32>
    %cst_18 = arith.constant dense<0.000000e+00> : vector<16x64xf32>
    %15 = tpu.matmul %4, %14, %cst_18 {dimension_numbers = #tpu.dot_dimension_numbers<[1], [0], [0], [1], [0, 0, 1, 1], [], []>} : vector<16x64xf32>, vector<64x64xf32>, vector<16x64xf32> -> vector<16x64xf32>
    %16 = vector.broadcast %11 : vector<1x64xf32> to vector<16x64xf32>
    %17 = arith.addf %16, %15 : vector<16x64xf32>
    %c3 = arith.constant 3 : index
    %c0_19 = arith.constant 0 : index
    %c0_20 = arith.constant 0 : index
    %18 = vector.load %arg3[%c3, %c0_19, %c0_20] : memref<6x64x64xf32, #tpu.memory_space<vmem>>, vector<1x64x64xf32>
    %19 = vector.shape_cast %18 : vector<1x64x64xf32> to vector<64x64xf32>
    %cst_21 = arith.constant dense<0.000000e+00> : vector<16x64xf32>
    %20 = tpu.matmul %4, %19, %cst_21 {dimension_numbers = #tpu.dot_dimension_numbers<[1], [0], [0], [1], [0, 0, 1, 1], [], []>} : vector<16x64xf32>, vector<64x64xf32>, vector<16x64xf32> -> vector<16x64xf32>
    %21 = vector.broadcast %12 : vector<1x64xf32> to vector<16x64xf32>
    %22 = arith.addf %21, %20 : vector<16x64xf32>
    %c1_22 = arith.constant 1 : index
    %c0_23 = arith.constant 0 : index
    %c0_24 = arith.constant 0 : index
    %23 = vector.load %arg3[%c1_22, %c0_23, %c0_24] : memref<6x64x64xf32, #tpu.memory_space<vmem>>, vector<1x64x64xf32>
    %24 = vector.shape_cast %23 : vector<1x64x64xf32> to vector<64x64xf32>
    %cst_25 = arith.constant dense<0.000000e+00> : vector<16x64xf32>
    %25 = tpu.matmul %7, %24, %cst_25 {dimension_numbers = #tpu.dot_dimension_numbers<[1], [0], [0], [1], [0, 0, 1, 1], [], []>} : vector<16x64xf32>, vector<64x64xf32>, vector<16x64xf32> -> vector<16x64xf32>
    %26 = arith.addf %17, %25 : vector<16x64xf32>
    %c4 = arith.constant 4 : index
    %c0_26 = arith.constant 0 : index
    %c0_27 = arith.constant 0 : index
    %27 = vector.load %arg3[%c4, %c0_26, %c0_27] : memref<6x64x64xf32, #tpu.memory_space<vmem>>, vector<1x64x64xf32>
    %28 = vector.shape_cast %27 : vector<1x64x64xf32> to vector<64x64xf32>
    %cst_28 = arith.constant dense<0.000000e+00> : vector<16x64xf32>
    %29 = tpu.matmul %7, %28, %cst_28 {dimension_numbers = #tpu.dot_dimension_numbers<[1], [0], [0], [1], [0, 0, 1, 1], [], []>} : vector<16x64xf32>, vector<64x64xf32>, vector<16x64xf32> -> vector<16x64xf32>
    %30 = arith.addf %22, %29 : vector<16x64xf32>
    %c2_29 = arith.constant 2 : index
    %c0_30 = arith.constant 0 : index
    %c0_31 = arith.constant 0 : index
    %31 = vector.load %arg3[%c2_29, %c0_30, %c0_31] : memref<6x64x64xf32, #tpu.memory_space<vmem>>, vector<1x64x64xf32>
    %32 = vector.shape_cast %31 : vector<1x64x64xf32> to vector<64x64xf32>
    %cst_32 = arith.constant dense<0.000000e+00> : vector<16x64xf32>
    %33 = tpu.matmul %10, %32, %cst_32 {dimension_numbers = #tpu.dot_dimension_numbers<[1], [0], [0], [1], [0, 0, 1, 1], [], []>} : vector<16x64xf32>, vector<64x64xf32>, vector<16x64xf32> -> vector<16x64xf32>
    %34 = arith.addf %26, %33 : vector<16x64xf32>
    %c5 = arith.constant 5 : index
    %c0_33 = arith.constant 0 : index
    %c0_34 = arith.constant 0 : index
    %35 = vector.load %arg3[%c5, %c0_33, %c0_34] : memref<6x64x64xf32, #tpu.memory_space<vmem>>, vector<1x64x64xf32>
    %36 = vector.shape_cast %35 : vector<1x64x64xf32> to vector<64x64xf32>
    %cst_35 = arith.constant dense<0.000000e+00> : vector<16x64xf32>
    %37 = tpu.matmul %10, %36, %cst_35 {dimension_numbers = #tpu.dot_dimension_numbers<[1], [0], [0], [1], [0, 0, 1, 1], [], []>} : vector<16x64xf32>, vector<64x64xf32>, vector<16x64xf32> -> vector<16x64xf32>
    %38 = arith.addf %30, %37 : vector<16x64xf32>
    %39 = arith.maximumf %34, %38 : vector<16x64xf32>
    %c0_36 = arith.constant 0 : index
    %c0_37 = arith.constant 0 : index
    %c0_38 = arith.constant 0 : index
    %40 = vector.load %arg5[%c0_36, %c0_37, %c0_38] : memref<2x8x16xf32, #tpu.memory_space<vmem>>, vector<1x8x16xf32>
    %41 = vector.shape_cast %40 : vector<1x8x16xf32> to vector<8x16xf32>
    %cst_39 = arith.constant dense<0.000000e+00> : vector<8x64xf32>
    %42 = tpu.matmul %41, %39, %cst_39 {dimension_numbers = #tpu.dot_dimension_numbers<[1], [0], [0], [1], [0, 0, 1, 1], [], []>} : vector<8x16xf32>, vector<16x64xf32>, vector<8x64xf32> -> vector<8x64xf32>
    %c1_40 = arith.constant 1 : index
    %c0_41 = arith.constant 0 : index
    %c0_42 = arith.constant 0 : index
    %43 = vector.load %arg5[%c1_40, %c0_41, %c0_42] : memref<2x8x16xf32, #tpu.memory_space<vmem>>, vector<1x8x16xf32>
    %44 = vector.shape_cast %43 : vector<1x8x16xf32> to vector<8x16xf32>
    %cst_43 = arith.constant dense<0.000000e+00> : vector<8x64xf32>
    %45 = tpu.matmul %44, %39, %cst_43 {dimension_numbers = #tpu.dot_dimension_numbers<[1], [0], [0], [1], [0, 0, 1, 1], [], []>} : vector<8x16xf32>, vector<16x64xf32>, vector<8x64xf32> -> vector<8x64xf32>
    %46 = arith.maximumf %42, %45 : vector<8x64xf32>
    %cst_44 = arith.constant 0.000000e+00 : f32
    %47 = vector.broadcast %cst_44 : f32 to vector<8x64xf32>
    %48 = arith.maximumf %46, %47 : vector<8x64xf32>
    %c0_45 = arith.constant 0 : index
    %c0_46 = arith.constant 0 : index
    %c0_47 = arith.constant 0 : index
    %49 = vector.load %arg6[%c0_45, %c0_46, %c0_47] : memref<3x8x8xf32, #tpu.memory_space<vmem>>, vector<1x8x8xf32>
    %50 = vector.shape_cast %49 : vector<1x8x8xf32> to vector<8x8xf32>
    %cst_48 = arith.constant dense<0.000000e+00> : vector<8x64xf32>
    %51 = tpu.matmul %50, %48, %cst_48 {dimension_numbers = #tpu.dot_dimension_numbers<[1], [0], [0], [1], [0, 0, 1, 1], [], []>} : vector<8x8xf32>, vector<8x64xf32>, vector<8x64xf32> -> vector<8x64xf32>
    %c1_49 = arith.constant 1 : index
    %c0_50 = arith.constant 0 : index
    %c0_51 = arith.constant 0 : index
    %52 = vector.load %arg6[%c1_49, %c0_50, %c0_51] : memref<3x8x8xf32, #tpu.memory_space<vmem>>, vector<1x8x8xf32>
    %53 = vector.shape_cast %52 : vector<1x8x8xf32> to vector<8x8xf32>
    %cst_52 = arith.constant dense<0.000000e+00> : vector<8x64xf32>
    %54 = tpu.matmul %53, %48, %cst_52 {dimension_numbers = #tpu.dot_dimension_numbers<[1], [0], [0], [1], [0, 0, 1, 1], [], []>} : vector<8x8xf32>, vector<8x64xf32>, vector<8x64xf32> -> vector<8x64xf32>
    %c2_53 = arith.constant 2 : index
    %c0_54 = arith.constant 0 : index
    %c0_55 = arith.constant 0 : index
    %55 = vector.load %arg6[%c2_53, %c0_54, %c0_55] : memref<3x8x8xf32, #tpu.memory_space<vmem>>, vector<1x8x8xf32>
    %56 = vector.shape_cast %55 : vector<1x8x8xf32> to vector<8x8xf32>
    %cst_56 = arith.constant dense<0.000000e+00> : vector<8x64xf32>
    %57 = tpu.matmul %56, %48, %cst_56 {dimension_numbers = #tpu.dot_dimension_numbers<[1], [0], [0], [1], [0, 0, 1, 1], [], []>} : vector<8x8xf32>, vector<8x64xf32>, vector<8x64xf32> -> vector<8x64xf32>
    %c0_57 = arith.constant 0 : index
    %c0_58 = arith.constant 0 : index
    %58 = vector.load %arg8[%c0_57, %c0_58] : memref<1x64xf32, #tpu.memory_space<vmem>>, vector<1x64xf32>
    %c0_59 = arith.constant 0 : index
    %c0_60 = arith.constant 0 : index
    %59 = vector.load %arg8[%c0_59, %c0_60] : memref<1x64xf32, #tpu.memory_space<vmem>>, vector<1x64xf32>
    %c0_61 = arith.constant 0 : index
    %c0_62 = arith.constant 0 : index
    %c0_63 = arith.constant 0 : index
    %60 = vector.load %arg7[%c0_61, %c0_62, %c0_63] : memref<6x64x64xf32, #tpu.memory_space<vmem>>, vector<1x64x64xf32>
    %61 = vector.shape_cast %60 : vector<1x64x64xf32> to vector<64x64xf32>
    %cst_64 = arith.constant dense<0.000000e+00> : vector<8x64xf32>
    %62 = tpu.matmul %51, %61, %cst_64 {dimension_numbers = #tpu.dot_dimension_numbers<[1], [0], [0], [1], [0, 0, 1, 1], [], []>} : vector<8x64xf32>, vector<64x64xf32>, vector<8x64xf32> -> vector<8x64xf32>
    %63 = vector.broadcast %58 : vector<1x64xf32> to vector<8x64xf32>
    %64 = arith.addf %63, %62 : vector<8x64xf32>
    %c3_65 = arith.constant 3 : index
    %c0_66 = arith.constant 0 : index
    %c0_67 = arith.constant 0 : index
    %65 = vector.load %arg7[%c3_65, %c0_66, %c0_67] : memref<6x64x64xf32, #tpu.memory_space<vmem>>, vector<1x64x64xf32>
    %66 = vector.shape_cast %65 : vector<1x64x64xf32> to vector<64x64xf32>
    %cst_68 = arith.constant dense<0.000000e+00> : vector<8x64xf32>
    %67 = tpu.matmul %51, %66, %cst_68 {dimension_numbers = #tpu.dot_dimension_numbers<[1], [0], [0], [1], [0, 0, 1, 1], [], []>} : vector<8x64xf32>, vector<64x64xf32>, vector<8x64xf32> -> vector<8x64xf32>
    %68 = vector.broadcast %59 : vector<1x64xf32> to vector<8x64xf32>
    %69 = arith.addf %68, %67 : vector<8x64xf32>
    %c1_69 = arith.constant 1 : index
    %c0_70 = arith.constant 0 : index
    %c0_71 = arith.constant 0 : index
    %70 = vector.load %arg7[%c1_69, %c0_70, %c0_71] : memref<6x64x64xf32, #tpu.memory_space<vmem>>, vector<1x64x64xf32>
    %71 = vector.shape_cast %70 : vector<1x64x64xf32> to vector<64x64xf32>
    %cst_72 = arith.constant dense<0.000000e+00> : vector<8x64xf32>
    %72 = tpu.matmul %54, %71, %cst_72 {dimension_numbers = #tpu.dot_dimension_numbers<[1], [0], [0], [1], [0, 0, 1, 1], [], []>} : vector<8x64xf32>, vector<64x64xf32>, vector<8x64xf32> -> vector<8x64xf32>
    %73 = arith.addf %64, %72 : vector<8x64xf32>
    %c4_73 = arith.constant 4 : index
    %c0_74 = arith.constant 0 : index
    %c0_75 = arith.constant 0 : index
    %74 = vector.load %arg7[%c4_73, %c0_74, %c0_75] : memref<6x64x64xf32, #tpu.memory_space<vmem>>, vector<1x64x64xf32>
    %75 = vector.shape_cast %74 : vector<1x64x64xf32> to vector<64x64xf32>
    %cst_76 = arith.constant dense<0.000000e+00> : vector<8x64xf32>
    %76 = tpu.matmul %54, %75, %cst_76 {dimension_numbers = #tpu.dot_dimension_numbers<[1], [0], [0], [1], [0, 0, 1, 1], [], []>} : vector<8x64xf32>, vector<64x64xf32>, vector<8x64xf32> -> vector<8x64xf32>
    %77 = arith.addf %69, %76 : vector<8x64xf32>
    %c2_77 = arith.constant 2 : index
    %c0_78 = arith.constant 0 : index
    %c0_79 = arith.constant 0 : index
    %78 = vector.load %arg7[%c2_77, %c0_78, %c0_79] : memref<6x64x64xf32, #tpu.memory_space<vmem>>, vector<1x64x64xf32>
    %79 = vector.shape_cast %78 : vector<1x64x64xf32> to vector<64x64xf32>
    %cst_80 = arith.constant dense<0.000000e+00> : vector<8x64xf32>
    %80 = tpu.matmul %57, %79, %cst_80 {dimension_numbers = #tpu.dot_dimension_numbers<[1], [0], [0], [1], [0, 0, 1, 1], [], []>} : vector<8x64xf32>, vector<64x64xf32>, vector<8x64xf32> -> vector<8x64xf32>
    %81 = arith.addf %73, %80 : vector<8x64xf32>
    %c5_81 = arith.constant 5 : index
    %c0_82 = arith.constant 0 : index
    %c0_83 = arith.constant 0 : index
    %82 = vector.load %arg7[%c5_81, %c0_82, %c0_83] : memref<6x64x64xf32, #tpu.memory_space<vmem>>, vector<1x64x64xf32>
    %83 = vector.shape_cast %82 : vector<1x64x64xf32> to vector<64x64xf32>
    %cst_84 = arith.constant dense<0.000000e+00> : vector<8x64xf32>
    %84 = tpu.matmul %57, %83, %cst_84 {dimension_numbers = #tpu.dot_dimension_numbers<[1], [0], [0], [1], [0, 0, 1, 1], [], []>} : vector<8x64xf32>, vector<64x64xf32>, vector<8x64xf32> -> vector<8x64xf32>
    %85 = arith.addf %77, %84 : vector<8x64xf32>
    %86 = arith.maximumf %81, %85 : vector<8x64xf32>
    %c0_85 = arith.constant 0 : index
    %c0_86 = arith.constant 0 : index
    %c0_87 = arith.constant 0 : index
    %87 = vector.load %arg9[%c0_85, %c0_86, %c0_87] : memref<2x4x8xf32, #tpu.memory_space<vmem>>, vector<1x4x8xf32>
    %88 = vector.shape_cast %87 : vector<1x4x8xf32> to vector<4x8xf32>
    %cst_88 = arith.constant dense<0.000000e+00> : vector<4x64xf32>
    %89 = tpu.matmul %88, %86, %cst_88 {dimension_numbers = #tpu.dot_dimension_numbers<[1], [0], [0], [1], [0, 0, 1, 1], [], []>} : vector<4x8xf32>, vector<8x64xf32>, vector<4x64xf32> -> vector<4x64xf32>
    %c1_89 = arith.constant 1 : index
    %c0_90 = arith.constant 0 : index
    %c0_91 = arith.constant 0 : index
    %90 = vector.load %arg9[%c1_89, %c0_90, %c0_91] : memref<2x4x8xf32, #tpu.memory_space<vmem>>, vector<1x4x8xf32>
    %91 = vector.shape_cast %90 : vector<1x4x8xf32> to vector<4x8xf32>
    %cst_92 = arith.constant dense<0.000000e+00> : vector<4x64xf32>
    %92 = tpu.matmul %91, %86, %cst_92 {dimension_numbers = #tpu.dot_dimension_numbers<[1], [0], [0], [1], [0, 0, 1, 1], [], []>} : vector<4x8xf32>, vector<8x64xf32>, vector<4x64xf32> -> vector<4x64xf32>
    %93 = arith.maximumf %89, %92 : vector<4x64xf32>
    %cst_93 = arith.constant 0.000000e+00 : f32
    %94 = vector.broadcast %cst_93 : f32 to vector<4x64xf32>
    %95 = arith.maximumf %93, %94 : vector<4x64xf32>
    %c0_94 = arith.constant 0 : index
    %c0_95 = arith.constant 0 : index
    %96 = vector.load %arg11[%c0_94, %c0_95] : memref<1x32xf32, #tpu.memory_space<vmem>>, vector<1x32xf32>
    %97 = vector.extract_strided_slice %95 {offsets = [0, 0], sizes = [1, 64], strides = [1, 1]} : vector<4x64xf32> to vector<1x64xf32>
    %c0_96 = arith.constant 0 : index
    %c0_97 = arith.constant 0 : index
    %c0_98 = arith.constant 0 : index
    %98 = vector.load %arg10[%c0_96, %c0_97, %c0_98] : memref<4x64x32xf32, #tpu.memory_space<vmem>>, vector<1x64x32xf32>
    %99 = vector.shape_cast %98 : vector<1x64x32xf32> to vector<64x32xf32>
    %cst_99 = arith.constant dense<0.000000e+00> : vector<1x32xf32>
    %100 = tpu.matmul %97, %99, %cst_99 {dimension_numbers = #tpu.dot_dimension_numbers<[1], [0], [0], [1], [0, 0, 1, 1], [], []>} : vector<1x64xf32>, vector<64x32xf32>, vector<1x32xf32> -> vector<1x32xf32>
    %101 = arith.addf %96, %100 : vector<1x32xf32>
    %102 = vector.extract_strided_slice %95 {offsets = [1, 0], sizes = [1, 64], strides = [1, 1]} : vector<4x64xf32> to vector<1x64xf32>
    %c1_100 = arith.constant 1 : index
    %c0_101 = arith.constant 0 : index
    %c0_102 = arith.constant 0 : index
    %103 = vector.load %arg10[%c1_100, %c0_101, %c0_102] : memref<4x64x32xf32, #tpu.memory_space<vmem>>, vector<1x64x32xf32>
    %104 = vector.shape_cast %103 : vector<1x64x32xf32> to vector<64x32xf32>
    %cst_103 = arith.constant dense<0.000000e+00> : vector<1x32xf32>
    %105 = tpu.matmul %102, %104, %cst_103 {dimension_numbers = #tpu.dot_dimension_numbers<[1], [0], [0], [1], [0, 0, 1, 1], [], []>} : vector<1x64xf32>, vector<64x32xf32>, vector<1x32xf32> -> vector<1x32xf32>
    %106 = arith.addf %101, %105 : vector<1x32xf32>
    %107 = vector.extract_strided_slice %95 {offsets = [2, 0], sizes = [1, 64], strides = [1, 1]} : vector<4x64xf32> to vector<1x64xf32>
    %c2_104 = arith.constant 2 : index
    %c0_105 = arith.constant 0 : index
    %c0_106 = arith.constant 0 : index
    %108 = vector.load %arg10[%c2_104, %c0_105, %c0_106] : memref<4x64x32xf32, #tpu.memory_space<vmem>>, vector<1x64x32xf32>
    %109 = vector.shape_cast %108 : vector<1x64x32xf32> to vector<64x32xf32>
    %cst_107 = arith.constant dense<0.000000e+00> : vector<1x32xf32>
    %110 = tpu.matmul %107, %109, %cst_107 {dimension_numbers = #tpu.dot_dimension_numbers<[1], [0], [0], [1], [0, 0, 1, 1], [], []>} : vector<1x64xf32>, vector<64x32xf32>, vector<1x32xf32> -> vector<1x32xf32>
    %111 = arith.addf %106, %110 : vector<1x32xf32>
    %112 = vector.extract_strided_slice %95 {offsets = [3, 0], sizes = [1, 64], strides = [1, 1]} : vector<4x64xf32> to vector<1x64xf32>
    %c3_108 = arith.constant 3 : index
    %c0_109 = arith.constant 0 : index
    %c0_110 = arith.constant 0 : index
    %113 = vector.load %arg10[%c3_108, %c0_109, %c0_110] : memref<4x64x32xf32, #tpu.memory_space<vmem>>, vector<1x64x32xf32>
    %114 = vector.shape_cast %113 : vector<1x64x32xf32> to vector<64x32xf32>
    %cst_111 = arith.constant dense<0.000000e+00> : vector<1x32xf32>
    %115 = tpu.matmul %112, %114, %cst_111 {dimension_numbers = #tpu.dot_dimension_numbers<[1], [0], [0], [1], [0, 0, 1, 1], [], []>} : vector<1x64xf32>, vector<64x32xf32>, vector<1x32xf32> -> vector<1x32xf32>
    %116 = arith.addf %111, %115 : vector<1x32xf32>
    %cst_112 = arith.constant 0.000000e+00 : f32
    %117 = vector.broadcast %cst_112 : f32 to vector<1x32xf32>
    %118 = arith.maximumf %116, %117 : vector<1x32xf32>
    %c0_113 = arith.constant 0 : index
    %c0_114 = arith.constant 0 : index
    %119 = vector.load %arg12[%c0_113, %c0_114] : memref<32x10xf32, #tpu.memory_space<vmem>>, vector<32x10xf32>
    %cst_115 = arith.constant dense<0.000000e+00> : vector<1x10xf32>
    %120 = tpu.matmul %118, %119, %cst_115 {dimension_numbers = #tpu.dot_dimension_numbers<[1], [0], [0], [1], [0, 0, 1, 1], [], []>} : vector<1x32xf32>, vector<32x10xf32>, vector<1x10xf32> -> vector<1x10xf32>
    %c0_116 = arith.constant 0 : index
    %c0_117 = arith.constant 0 : index
    %121 = vector.load %arg13[%c0_116, %c0_117] : memref<1x10xf32, #tpu.memory_space<vmem>>, vector<1x10xf32>
    %122 = arith.addf %120, %121 : vector<1x10xf32>
    %c0_118 = arith.constant 0 : index
    %c0_119 = arith.constant 0 : index
    %c0_120 = arith.constant 0 : index
    %123 = vector.load %arg14[%c0_118, %c0_119, %c0_120] : memref<1x1x10xf32, #tpu.memory_space<vmem>>, vector<1x1x10xf32>
    %124 = vector.shape_cast %123 : vector<1x1x10xf32> to vector<1x10xf32>
    %125 = vector.shape_cast %122 : vector<1x10xf32> to vector<1x1x10xf32>
    tpu.vector_store %arg14[%c0_118, %c0_119, %c0_120], %125 {strides = array<i32>} : memref<1x1x10xf32, #tpu.memory_space<vmem>>, vector<1x1x10xf32>,
    return
  }
  func.func @transform_0(%arg0: i32) -> (i32, i32, i32) {
    %c0_i32 = arith.constant 0 : i32
    %c0_i32_0 = arith.constant 0 : i32
    %c0_i32_1 = arith.constant 0 : i32
    return %arg0, %c0_i32, %c0_i32_0 : i32, i32, i32
  }
  func.func @transform_1(%arg0: i32) -> (i32, i32, i32) {
    %c0_i32 = arith.constant 0 : i32
    %c0_i32_0 = arith.constant 0 : i32
    %c0_i32_1 = arith.constant 0 : i32
    %c0_i32_2 = arith.constant 0 : i32
    return %c0_i32, %c0_i32_0, %c0_i32_1 : i32, i32, i32
  }
  func.func @transform_2(%arg0: i32) -> (i32, i32, i32) {
    %c0_i32 = arith.constant 0 : i32
    %c0_i32_0 = arith.constant 0 : i32
    %c0_i32_1 = arith.constant 0 : i32
    %c0_i32_2 = arith.constant 0 : i32
    return %c0_i32, %c0_i32_0, %c0_i32_1 : i32, i32, i32
  }
  func.func @transform_3(%arg0: i32) -> (i32, i32) {
    %c0_i32 = arith.constant 0 : i32
    %c0_i32_0 = arith.constant 0 : i32
    %c0_i32_1 = arith.constant 0 : i32
    return %c0_i32, %c0_i32_0 : i32, i32
  }
  func.func @transform_4(%arg0: i32) -> (i32, i32, i32) {
    %c0_i32 = arith.constant 0 : i32
    %c0_i32_0 = arith.constant 0 : i32
    %c0_i32_1 = arith.constant 0 : i32
    %c0_i32_2 = arith.constant 0 : i32
    return %c0_i32, %c0_i32_0, %c0_i32_1 : i32, i32, i32
  }
  func.func @transform_5(%arg0: i32) -> (i32, i32, i32) {
    %c0_i32 = arith.constant 0 : i32
    %c0_i32_0 = arith.constant 0 : i32
    %c0_i32_1 = arith.constant 0 : i32
    %c0_i32_2 = arith.constant 0 : i32
    return %c0_i32, %c0_i32_0, %c0_i32_1 : i32, i32, i32
  }
  func.func @transform_6(%arg0: i32) -> (i32, i32, i32) {
    %c0_i32 = arith.constant 0 : i32
    %c0_i32_0 = arith.constant 0 : i32
    %c0_i32_1 = arith.constant 0 : i32
    %c0_i32_2 = arith.constant 0 : i32
    return %c0_i32, %c0_i32_0, %c0_i32_1 : i32, i32, i32
  }
  func.func @transform_7(%arg0: i32) -> (i32, i32) {
    %c0_i32 = arith.constant 0 : i32
    %c0_i32_0 = arith.constant 0 : i32
    %c0_i32_1 = arith.constant 0 : i32
    return %c0_i32, %c0_i32_0 : i32, i32
  }
  func.func @transform_8(%arg0: i32) -> (i32, i32, i32) {
    %c0_i32 = arith.constant 0 : i32
    %c0_i32_0 = arith.constant 0 : i32
    %c0_i32_1 = arith.constant 0 : i32
    %c0_i32_2 = arith.constant 0 : i32
    return %c0_i32, %c0_i32_0, %c0_i32_1 : i32, i32, i32
  }
  func.func @transform_9(%arg0: i32) -> (i32, i32, i32) {
    %c0_i32 = arith.constant 0 : i32
    %c0_i32_0 = arith.constant 0 : i32
    %c0_i32_1 = arith.constant 0 : i32
    %c0_i32_2 = arith.constant 0 : i32
    return %c0_i32, %c0_i32_0, %c0_i32_1 : i32, i32, i32
  }
  func.func @transform_10(%arg0: i32) -> (i32, i32) {
    %c0_i32 = arith.constant 0 : i32
    %c0_i32_0 = arith.constant 0 : i32
    %c0_i32_1 = arith.constant 0 : i32
    return %c0_i32, %c0_i32_0 : i32, i32
  }
  func.func @transform_11(%arg0: i32) -> (i32, i32) {
    %c0_i32 = arith.constant 0 : i32
    %c0_i32_0 = arith.constant 0 : i32
    %c0_i32_1 = arith.constant 0 : i32
    return %c0_i32, %c0_i32_0 : i32, i32
  }
  func.func @transform_12(%arg0: i32) -> (i32, i32) {
    %c0_i32 = arith.constant 0 : i32
    %c0_i32_0 = arith.constant 0 : i32
    %c0_i32_1 = arith.constant 0 : i32
    return %c0_i32, %c0_i32_0 : i32, i32
  }
  func.func @transform_13(%arg0: i32) -> (i32, i32, i32) {
    %c0_i32 = arith.constant 0 : i32
    %c0_i32_0 = arith.constant 0 : i32
    %c0_i32_1 = arith.constant 0 : i32
    return %arg0, %c0_i32, %c0_i32_0 : i32, i32, i32
  }
}

</mosaic_0001>

<bundles_post_ra>
// kernel: tinyml_forward.1
= control target key start
LH: loop header
LB: loop body
LE: loop exit
PB: predicated region body
PF: predicated region fallthrough
CT: control target
= control target key end

     0   :  { %18 = vsyncpa [#allocation3], 0  ;;  %s4592_s0 = inlined_call_operand.vmem [shape: f32[2,16,64], index: 0, kind: input, shape index: {}]   ;;  %s4593_s1 = inlined_call_operand.vmem [shape: f32[3,16,16], index: 1, kind: input, shape index: {}]   ;;  %s4594_s2 = inlined_call_operand.vmem [shape: f32[6,64,64], index: 2, kind: input, shape index: {}]   ;;  %s4595_s3 = inlined_call_operand.vmem [shape: f32[1,64], index: 3, kind: input, shape index: {}]   ;;  %s4596_s4 = inlined_call_operand.vmem [shape: f32[2,8,16], index: 4, kind: input, shape index: {}]   ;;  %s4597_s5 = inlined_call_operand.vmem [shape: f32[3,8,8], index: 5, kind: input, shape index: {}]   ;;  %s4598_s6 = inlined_call_operand.vmem [shape: f32[6,64,64], index: 6, kind: input, shape index: {}]   ;;  %s4599_s7 = inlined_call_operand.vmem [shape: f32[1,64], index: 7, kind: input, shape index: {}]   ;;  %s4600_s8 = inlined_call_operand.vmem [shape: f32[2,4,8], index: 8, kind: input, shape index: {}]   ;;  %s4601_s9 = inlined_call_operand.vmem [shape: f32[4,64,32], index: 9, kind: input, shape index: {}]   ;;  %s4602_s10 = inlined_call_operand.vmem [shape: f32[1,32], index: 10, kind: input, shape index: {}]   ;;  %s4603_s11 = inlined_call_operand.vmem [shape: f32[32,10], index: 11, kind: input, shape index: {}]   ;;  %s4604_s12 = inlined_call_operand.vmem [shape: f32[1,10], index: 12, kind: input, shape index: {}]   ;;  %s4605_s13 = inlined_call_operand.hbm [shape: f32[2,1,10], index: 13, kind: output, shape index: {}]  }
   0x1   :  { %20 = vsyncpa [#allocation3 + $0x1], 0  ;;  %s3907_s25 = smov 0   ;;  %s3909_s26 = smov 0  }
   0x2   :  { %s3911_s27 = smov 0   ;;  %s3913_s28 = smov 0  }
   0x3 LB: > { %4610 = sst [smem:[#allocation5_spill]] %s3827_s27  ;;  %s3928_s29 = sadd.s32 4294967295, %s3831_s28   ;;  %s3831_s28 = sphi %s3913_s28, %s4617_s28   ;;  %s3827_s27 = sphi %s3911_s27, %s4619_s27   ;;  %s3823_s26 = sphi %s3909_s26, %s4621_s26   ;;  %s3819_s25 = sphi %s3907_s25, %s4620_s25  }
   0x4   : > { %s2740_s30 = sadd.s32 4294967294, %s3831_s28   ;;  %s3932_s14 = sadd.s32 1, %s3831_s28  }
   0x5   : > { %4611 = sst [smem:[#allocation6_spill]] %s3932_s14  ;;  %s311_s15 = sadd.s32 1, %s3827_s27 }
   0x6   : > { %s308_s16 = ssub.s32 %s3831_s28, %s3932_s14  ;;  %p321_p0 = scmp.ne.s32.totalorder %s3827_s27, %s3823_s26 }
   0x7   : > { %p309_p1 = scmp.eq.s32.totalorder %s308_s16, 0  ;;  %p322_p2 = scmp.eq.s32.totalorder %s3928_s29, 1 }
   0x8   : > { %p327_p3 = scmp.ne.s32.totalorder %s3823_s26, %s3819_s25  ;;  %p328_p4 = scmp.eq.s32.totalorder %s2740_s30, 1 }
   0x9   : > { %s3943_s17 = scalar_select %p309_p1, %s3827_s27, %s311_s15  }
   0xa   : > { %p3945_p5 = por %p322_p2, %p321_p0  ;;  %p3949_p6 = por %p328_p4, %p327_p3 }
   0xb   : > { %4612 = sst [smem:[#allocation7_spill]] %s3943_s17  ;;  %p2743_p7 = scmp.ge.s32.totalorder %s3831_s28, 1 }
   0xc   : > { %s4614_s19 = scalar_select %p3949_p6, 1, 0 }
   0xd   : > { %p390_p8 = scmp.lt.s32.totalorder %s3831_s28, 3 }
   0xe   : > { %4615 = sst [smem:[#allocation8_spill]] %s4614_s19 }
   0xf   : > { %p391_p9 = pnand %p2743_p7, %p390_p8 }
  0x10   : > { %p433_p10 = scmp.lt.s32.totalorder (!%p391_p9), %s3928_s29, 1  ;;  %v440_v0 = vld [vmem:[%s4593_s1] sm:$0xff] (!%p391_p9)  ;;  %vm442_vm0 = vcmask (!%p391_p9), 130048   ;;  %v694_v2 = vld [vmem:[%s4594_s2 + $0x8] sm:$0xff] (!%p391_p9)  ;;  %v695_v3 = vld [vmem:[%s4594_s2 + $0x10] sm:$0xff] (!%p391_p9)  ;;  %vm701_vm1 = vcmask (!%p391_p9), 523264  }
  0x11   : > { %394 = sbr.rel (%p391_p9) target bundleno = 1921 (0x781), region = 72  ;;  %3087 = vmatprep.mubr.msk.f32.mxu0 (!%p391_p9), %vm442_vm0, %v440_v0  ;;  %v693_v1 = vld [vmem:[%s4594_s2] sm:$0xff] (!%p391_p9)  ;;  %v696_v5 = vld [vmem:[%s4594_s2 + $0x18] sm:$0xff] (!%p391_p9)  ;;  %v698_v8 = vld [vmem:[%s4594_s2 + $0x28] sm:$0xff] (!%p391_p9)  ;;  %vm3834_vm2 = vmmov (!%p391_p9), 0   ;;  %vm1387_vm3 = vcmask (!%p391_p9), 64512  }
  0x12   : > { %v3470_v4 = vpack.c.bf16 (!%p391_p9), %v694_v2, %v693_v1  ;;  %v3474_v6 = vpack.c.bf16 (!%p391_p9), %v696_v5, %v695_v3  ;;  %v697_v7 = vld [vmem:[%s4594_s2 + $0x20] sm:$0xff] (!%p391_p9)  ;;  %v699_v13 = vld [vmem:[%s4594_s2 + $0x30] sm:$0xff] (!%p391_p9)  ;;  %v700_v14 = vld [vmem:[%s4594_s2 + $0x38] sm:$0xff] (!%p391_p9)  ;;  %vm2596_vm4 = vcmask (!%p391_p9), 261120   ;;  %s2896_s30 = sshll.u32 (!%p391_p9), %s3928_s29, 4  ;;  %vm2670_vm5 = vcmask (!%p391_p9), 73728  }
  0x13   : > { %v3478_v12 = vpack.c.bf16 (!%p391_p9), %v698_v8, %v697_v7  ;;  %v441_v15 = vld [vmem:[%s4593_s1 + $0x8] sm:$0xff] (!%p391_p9)  ;;  %v2748_v16 = vld [vmem:[%s4593_s1 + $0x10] sm:$0xff] (!%p391_p9)  ;;  %v3482_v17 = vpack.c.bf16 (!%p391_p9), %v700_v14, %v699_v13  ;;  %v2749_v18 = vld [vmem:[%s4593_s1 + $0x18] sm:$0xff] (!%p391_p9)  ;;  %s4550_s14 = scalar_lea.hbm (!%p391_p9), %s4605_s13, %s2896_s30 }
  0x14   : > { %3471 = vmatprep.subr.bf16.mxu1 (!%p391_p9), %v3470_v4  ;;  %v2752_v19 = vld [vmem:[%s4593_s1 + $0x20] sm:$0xff] (!%p391_p9)  ;;  %v2753_v20 = vld [vmem:[%s4593_s1 + $0x28] sm:$0xff] (!%p391_p9)  ;;  %v2801_v27 = vld [vmem:[%s4594_s2 + $0x150] sm:$0xff] (!%p391_p9) }
  0x15   : > { %3473 = vmatpush3.bf16.msra.mxu1 (!%p391_p9), %v3470_v4  ;;  %v2759_v21 = vld [vmem:[%s4594_s2 + $0xc0] sm:$0xff] (!%p391_p9)  ;;  %v2760_v22 = vld [vmem:[%s4594_s2 + $0xc8] sm:$0xff] (!%p391_p9)  ;;  %v2802_v28 = vld [vmem:[%s4594_s2 + $0x158] sm:$0xff] (!%p391_p9) }
  0x16   : > { %3475 = vmatprep.subr.bf16.mxu1 (!%p391_p9), %v3474_v6  ;;  %v3486_v23 = vpack.c.bf16 (!%p391_p9), %v2760_v22, %v2759_v21  ;;  %v2799_v24 = vld [vmem:[%s4594_s2 + $0x140] sm:$0xff] (!%p391_p9)  ;;  %v2800_v25 = vld [vmem:[%s4594_s2 + $0x148] sm:$0xff] (!%p391_p9)  ;;  %v3554_v29 = vpack.c.bf16 (!%p391_p9), %v2802_v28, %v2801_v27  ;;  %v2805_v33 = vld [vmem:[%s4594_s2 + $0x170] sm:$0xff] (!%p391_p9) }
  0x17   : > { %v3550_v26 = vpack.c.bf16 (!%p391_p9), %v2800_v25, %v2799_v24  ;;  %v2803_v30 = vld [vmem:[%s4594_s2 + $0x160] sm:$0xff] (!%p391_p9)  ;;  %v2804_v31 = vld [vmem:[%s4594_s2 + $0x168] sm:$0xff] (!%p391_p9)  ;;  %v2806_v34 = vld [vmem:[%s4594_s2 + $0x178] sm:$0xff] (!%p391_p9)  ;;  %v3835_v24 = vmov (!%p391_p9), 0.0  }
  0x18   : > { %s434_s22 = scalar_select %p433_p10, %s3928_s29, 1  ;;  %v3558_v32 = vpack.c.bf16 %v2804_v31, %v2803_v30  ;;  %v3562_v35 = vpack.c.bf16 %v2806_v34, %v2805_v33  ;;  %v2761_v36 = vld [vmem:[%s4594_s2 + $0xd0] sm:$0xff]  ;;  %v2762_v37 = vld [vmem:[%s4594_s2 + $0xd8] sm:$0xff]  ;;  %v2763_v41 = vld [vmem:[%s4594_s2 + $0xe0] sm:$0xff] }
  0x19   : > { %3477 = vmatpush3.bf16.msra.mxu1 %v3474_v6  ;;  %v3490_v40 = vpack.c.bf16 %v2762_v37, %v2761_v36  ;;  %v2764_v42 = vld [vmem:[%s4594_s2 + $0xe8] sm:$0xff]  ;;  %v2765_v46 = vld [vmem:[%s4594_s2 + $0xf0] sm:$0xff]  ;;  %v2766_v47 = vld [vmem:[%s4594_s2 + $0xf8] sm:$0xff]  ;;  %s3836_s29 = smov [#allocation2]  }
  0x1a   : > { %s2899_s21 = sshll.u32 %s434_s22, 4  ;;  %3479 = vmatprep.subr.bf16.mxu1 %v3478_v12  ;;  %v3494_v44 = vpack.c.bf16 %v2764_v42, %v2763_v41  ;;  %v3498_v49 = vpack.c.bf16 %v2766_v47, %v2765_v46  ;;  %v2769_v51 = vld [vmem:[%s4594_s2 + $0x40] sm:$0xff]  ;;  %v2770_v52 = vld [vmem:[%s4594_s2 + $0x48] sm:$0xff]  ;;  %v2771_v54 = vld [vmem:[%s4594_s2 + $0x50] sm:$0xff]  ;;  %s3773_s20 = sshll.u32 %s3836_s29, 4  ;;  %s3774_s20 = int_to_ptr.vmem [resolvable:$false] %s3773_s20 }
  0x1b   : > { %s437_s17 = scalar_lea.vmem %s4592_s0, %s2899_s21  ;;  %v3502_v53 = vpack.c.bf16 %v2770_v52, %v2769_v51  ;;  %v2772_v55 = vld [vmem:[%s4594_s2 + $0x58] sm:$0xff]  ;;  %v2773_v57 = vld [vmem:[%s4594_s2 + $0x60] sm:$0xff]  ;;  %v2774_v58 = vld [vmem:[%s4594_s2 + $0x68] sm:$0xff]  ;;  %s431_s21 = sand.u32 1, %s3823_s26  }
  0x1c   : > { %v438_v9 = vld [vmem:[%s437_s17] sm:$0xff]  ;;  %v439_v10 = vld [vmem:[%s437_s17 + $0x8] sm:$0xff]  ;;  %v3506_v56 = vpack.c.bf16 %v2772_v55, %v2771_v54  ;;  %v3510_v59 = vpack.c.bf16 %v2774_v58, %v2773_v57  ;;  %v2775_v60 = vld [vmem:[%s4594_s2 + $0x70] sm:$0xff]  ;;  %s432_s15 = scalar_lea.vmem [#allocation2], %s431_s21  ;;  %s2673_s19 = scalar_lea.sflag [#allocation3], %s431_s21 }
  0x1d   : > { %v3458_v11 = vpack.c.bf16 %v439_v10, %v438_v9  ;;  %3481 = vmatpush3.bf16.msra.mxu1 %v3478_v12  ;;  %v2776_v61 = vld [vmem:[%s4594_s2 + $0x78] sm:$0xff]  ;;  %v2779_v63 = vld [vmem:[%s4594_s2 + $0x100] sm:$0xff]  ;;  %v2780_v0 = vld [vmem:[%s4594_s2 + $0x108] sm:$0xff]  ;;  %s2685_s17 = sshll.u32 %s432_s15, 4  ;;  %s3775_s23 = scalar_lea.vmem %s3774_s20, 32  ;;  %s4552_s17 = int_to_ptr.vmem [resolvable:$true] %s2685_s17 }
  0x1e   : > { %3483 = vmatprep.subr.bf16.mxu1 %v3482_v17  ;;  %v3514_v62 = vpack.c.bf16 %v2776_v61, %v2775_v60  ;;  %v3518_v1 = vpack.c.bf16 %v2780_v0, %v2779_v63  ;;  %v2781_v2 = vld [vmem:[%s4594_s2 + $0x110] sm:$0xff]  ;;  %v2782_v3 = vld [vmem:[%s4594_s2 + $0x118] sm:$0xff]  ;;  %v2783_v5 = vld [vmem:[%s4594_s2 + $0x120] sm:$0xff]  ;;  %s3769_s16 = scalar_lea.vmem %s4552_s17, 16  ;;  %p3776_p0 = scmp.lt.s32.totalorder %s4552_s17, %s3774_s20 }
  0x1f   : > { %3459 = vmatprep.subr.bf16.mxu0 %v3458_v11  ;;  %v3522_v4 = vpack.c.bf16 %v2782_v3, %v2781_v2  ;;  %v2784_v6 = vld [vmem:[%s4594_s2 + $0x128] sm:$0xff]  ;;  %v2785_v8 = vld [vmem:[%s4594_s2 + $0x130] sm:$0xff]  ;;  %v2786_v9 = vld [vmem:[%s4594_s2 + $0x138] sm:$0xff]  ;;  %p3770_p11 = scmp.ne.s32.totalorder %s4552_s17, %s3769_s16  ;;  %p3777_p1 = scmp.lt.s32.totalorder %s3775_s23, %s3769_s16 }
  0x20   : > { %3461 = vmatpush3.bf16.msra.mxu0 %v3458_v11  ;;  %v3526_v7 = vpack.c.bf16 %v2784_v6, %v2783_v5  ;;  %v3530_v10 = vpack.c.bf16 %v2786_v9, %v2785_v8  ;;  %v2790_v12 = vld [vmem:[%s4594_s2 + $0x88] sm:$0xff]  ;;  %v2791_v14 = vld [vmem:[%s4594_s2 + $0x90] sm:$0xff]  ;;  %v2796_v21 = vld [vmem:[%s4594_s2 + $0xb8] sm:$0xff] }
  0x21   : > { %3463 = vmatprep.subr.bf16.mxu0 %v3458_v11  ;;  %3485 = vmatpush3.bf16.msra.mxu1 %v3482_v17  ;;  %v2793_v17 = vld [vmem:[%s4594_s2 + $0xa0] sm:$0xff]  ;;  %v2810_v42 = vld [vmem:[%s4596_s4 + $0x8] sm:$0xff]  ;;  %v1615_v57 = vld [vmem:[%s4598_s6 + $0x18] sm:$0xff]  ;;  %p3771_p12 = pnand %p3770_p11, %p3945_p5  ;;  %p3778_p2 = por %p3777_p1, %p3776_p0 }
  0x22   : > { %3487 = vmatprep.subr.bf16.mxu1 %v3486_v23  ;;  %v2758_v27 = vld [vmem:[%s4595_s3] ss:$0 sm:$0xff]  ;;  %v2813_v52 = vld [vmem:[%s4597_s5 + $0x8] sm:$0xff]  ;;  %v2815_v58 = vld [vmem:[%s4597_s5 + $0x10] sm:$0xff] }
  0x23   : > { %3088 = vmatmul.mubr.msk.f32.vlgmr.msra.gmra.mrb[0].mxu0 %vm442_vm0, %v441_v15  ;;  %v2792_v15 = vld [vmem:[%s4594_s2 + $0x98] sm:$0xff]  ;;  %v1235_v41 = vld [vmem:[%s4596_s4] sm:$0xff]  ;;  %v2820_v54 = vld [vmem:[%s4598_s6 + $0xc8] sm:$0xff]  ;;  %p3772_p13 = pneg %p3771_p12 }
  0x24   : > { %3465 = vmatpush3.bf16.msra.mxu0 %v3458_v11  ;;  %3094 = vmatprep.mubr.msk.f32.mxu0 %vm442_vm0, %v2748_v16  ;;  %v3538_v16 = vpack.c.bf16 %v2792_v15, %v2791_v14  ;;  %v1386_v51 = vld [vmem:[%s4597_s5] sm:$0xff]  ;;  %v2821_v60 = vld [vmem:[%s4598_s6 + $0xd0] sm:$0xff]  ;;  %v2822_v61 = vld [vmem:[%s4598_s6 + $0xd8] sm:$0xff] }
  0x25   : > { %3467 = vmatprep.subr.bf16.mxu0 %v3458_v11  ;;  %v1616_v63 = vld [vmem:[%s4598_s6 + $0x20] sm:$0xff]  ;;  %v1617_v0 = vld [vmem:[%s4598_s6 + $0x28] sm:$0xff]  ;;  %v1618_v5 = vld [vmem:[%s4598_s6 + $0x30] sm:$0xff]  ;;  %p3779_p3 = pnand %p3778_p2, %p3772_p13 }
  0x26   : > { %v2823_v2 = vld [vmem:[%s4598_s6 + $0xe0] sm:$0xff]  ;;  %v2824_v3 = vld [vmem:[%s4598_s6 + $0xe8] sm:$0xff]  ;;  %v1619_v6 = vld [vmem:[%s4598_s6 + $0x38] sm:$0xff] }
  0x27   : > { %3095 = vmatmul.mubr.msk.f32.vlgmr.msra.gmra.mrb[2].mxu0 %vm442_vm0, %v2749_v18  ;;  %v2794_v18 = vld [vmem:[%s4594_s2 + $0xa8] sm:$0xff]  ;;  %v2825_v8 = vld [vmem:[%s4598_s6 + $0xf0] sm:$0xff]  ;;  %v2826_v9 = vld [vmem:[%s4598_s6 + $0xf8] sm:$0xff] }
  0x28   : > { %3469 = vmatpush3.bf16.msra.mxu0 %v3458_v11  ;;  %3101 = vmatprep.mubr.msk.f32.mxu0 %vm442_vm0, %v2752_v19  ;;  %v2789_v11 = vld [vmem:[%s4594_s2 + $0x80] sm:$0xff]  ;;  %v3542_v19 = vpack.c.bf16 %v2794_v18, %v2793_v17  ;;  %v2838_v15 = vld [vmem:[%s4598_s6 + $0x108] sm:$0xff]  ;;  %v2830_v18 = vld [vmem:[%s4598_s6 + $0x50] sm:$0xff] }
  0x29   : > { %3551 = vmatprep.subr.bf16.mxu0 %v3550_v26  ;;  %v3534_v13 = vpack.c.bf16 %v2790_v12, %v2789_v11  ;;  %v3594_v11 = vpack.c.bf16 %v2826_v9, %v2825_v8  ;;  %v2828_v12 = vld [vmem:[%s4598_s6 + $0x40] sm:$0xff] }
  0x2a   : > { %v2837_v14 = vld [vmem:[%s4598_s6 + $0x100] sm:$0xff] }
  0x2b   : > { %3102 = vmatmul.mubr.msk.f32.vlgmr.msra.gmra.mrb[4].mxu0 %vm442_vm0, %v2753_v20  ;;  %v2795_v20 = vld [vmem:[%s4594_s2 + $0xb0] sm:$0xff]  ;;  %v3609_v17 = vpack.c.bf16 %v2838_v15, %v2837_v14  ;;  %v2107_v14 = vld [vmem:[%s4600_s8] sm:$0xf]  ;;  %v2865_v15 = vld [vmem:[%s4600_s8 + $0x4] sm:$0xf] }
  0x2c   : > { %3553 = vmatpush3.bf16.msra.mxu0 %v3550_v26  ;;  %v3546_v22 = vpack.c.bf16 %v2796_v21, %v2795_v20  ;;  %v2839_v20 = vld [vmem:[%s4598_s6 + $0x110] sm:$0xff]  ;;  %v2840_v21 = vld [vmem:[%s4598_s6 + $0x118] sm:$0xff] }
  0x2d   : > { %3555 = vmatprep.subr.bf16.mxu0 %v3554_v29 }
  0x30   : > { %3557 = vmatpush3.bf16.msra.mxu0 %v3554_v29 }
  0x31   : > { %3559 = vmatprep.subr.bf16.mxu0 %v3558_v32 }
  0x34   : > { %3561 = vmatpush3.bf16.msra.mxu0 %v3558_v32 }
  0x35   : > { %3563 = vmatprep.subr.bf16.mxu0 %v3562_v35 }
  0x38   : > { %3565 = vmatpush3.bf16.msra.mxu0 %v3562_v35 }
  0xf6   : > { %v3089_v38 = vpop.f32.mrb[0].mxu0 }
  0xf7   : > { %v515_v39 = vpop.f32.mrb[1].mxu0 }
  0xf8   : > { %3120 = vmatprep.mubr.msk.f32.mxu1 %vm701_vm1, %v515_v39 }
  0xf9   : > { %3121 = vmatmul.mubr.msk.f32.vlgmr.msra.gmra.mrb[0].mxu1 %vm701_vm1, %v3089_v38 }
  0xfa   : > { %3489 = vmatpush3.bf16.msra.mxu1 %v3486_v23  ;;  %3139 = vmatprep.mubr.msk.f32.mxu1 %vm701_vm1, %v515_v39  ;;  %v4053_v43 = vpop.f32.mrb[2].mxu0  ;;  %v3833_v23 = vmov 0.0|0.0  }
  0xfb   : > { %3491 = vmatprep.subr.bf16.mxu1 %v3490_v40  ;;  %v599_v45 = vpop.f32.mrb[3].mxu0  ;;  %3569 = vmatprep.subr.bf16.mxu0 %v3833_v23 }
  0xfe   : > { %3493 = vmatpush3.bf16.msra.mxu1 %v3490_v40  ;;  %v4061_v48 = vpop.f32.mrb[4].mxu0 }
  0xff   : > { %3495 = vmatprep.subr.bf16.mxu1 %v3494_v44  ;;  %v683_v50 = vpop.f32.mrb[5].mxu0 }
 0x100   : > { %3215 = vmatprep.mubr.msk.f32.mxu0 %vm701_vm1, %v683_v50 }
 0x101   : > { %3216 = vmatmul.mubr.msk.f32.vlgmr.msra.gmra.mrb[6].mxu0 %vm701_vm1, %v4061_v48 }
 0x102   : > { %3497 = vmatpush3.bf16.msra.mxu1 %v3494_v44  ;;  %3229 = vmatprep.mubr.msk.f32.mxu0 %vm3834_vm2, %v3835_v24 }
 0x103   : > { %3499 = vmatprep.subr.bf16.mxu1 %v3498_v49 }
 0x106   : > { %3501 = vmatpush3.bf16.msra.mxu1 %v3498_v49  ;;  %v1613_v49 = vld [vmem:[%s4598_s6 + $0x8] sm:$0xff] }
 0x107   : > { %3503 = vmatprep.subr.bf16.mxu1 %v3502_v53 }
 0x109   : > { %3140 = vmatmul.mubr.msk.f32.vlgmr.msra.gmra.mrb[2].mxu1 %vm701_vm1, %v3089_v38 }
 0x10a   : > { %3505 = vmatpush3.bf16.msra.mxu1 %v3502_v53  ;;  %3158 = vmatprep.mubr.msk.f32.mxu1 %vm701_vm1, %v599_v45  ;;  %v2819_v53 = vld [vmem:[%s4598_s6 + $0xc0] sm:$0xff] }
 0x10b   : > { %3507 = vmatprep.subr.bf16.mxu1 %v3506_v56 }
 0x10e   : > { %3509 = vmatpush3.bf16.msra.mxu1 %v3506_v56  ;;  %v1614_v56 = vld [vmem:[%s4598_s6 + $0x10] sm:$0xff] }
 0x10f   : > { %3511 = vmatprep.subr.bf16.mxu1 %v3510_v59 }
 0x112   : > { %3513 = vmatpush3.bf16.msra.mxu1 %v3510_v59  ;;  %v3585_v59 = vpack.c.bf16 %v2820_v54, %v2819_v53  ;;  %v2858_v53 = vld [vmem:[%s4598_s6 + $0x158] sm:$0xff] }
 0x113   : > { %3515 = vmatprep.subr.bf16.mxu1 %v3514_v62 }
 0x116   : > { %3517 = vmatpush3.bf16.msra.mxu1 %v3514_v62  ;;  %v3576_v62 = vpack.c.bf16 %v1615_v57, %v1614_v56  ;;  %v2850_v56 = vld [vmem:[%s4598_s6 + $0xa0] sm:$0xff]  ;;  %v2851_v57 = vld [vmem:[%s4598_s6 + $0xa8] sm:$0xff] }
 0x117   : > { %3519 = vmatprep.subr.bf16.mxu1 %v3518_v1 }
 0x119   : > { %3159 = vmatmul.mubr.msk.f32.vlgmr.msra.gmra.mrb[0].mxu1 %vm701_vm1, %v4053_v43 }
 0x11a   : > { %3521 = vmatpush3.bf16.msra.mxu1 %v3518_v1  ;;  %3177 = vmatprep.mubr.msk.f32.mxu1 %vm701_vm1, %v599_v45  ;;  %v3588_v1 = vpack.c.bf16 %v2822_v61, %v2821_v60  ;;  %v3627_v60 = vpack.c.bf16 %v2851_v57, %v2850_v56  ;;  %v2881_v56 = vld [vmem:[%s4601_s9 + $0xa0] sm:$0xff]  ;;  %v2882_v57 = vld [vmem:[%s4601_s9 + $0xa8] sm:$0xff] }
 0x11b   : > { %3523 = vmatprep.subr.bf16.mxu1 %v3522_v4 }
 0x11e   : > { %3525 = vmatpush3.bf16.msra.mxu1 %v3522_v4  ;;  %v3579_v4 = vpack.c.bf16 %v1617_v0, %v1616_v63  ;;  %v2853_v63 = vld [vmem:[%s4598_s6 + $0xb8] sm:$0xff]  ;;  %v2861_v0 = vld [vmem:[%s4598_s6 + $0x170] sm:$0xff] }
 0x11f   : > { %3527 = vmatprep.subr.bf16.mxu1 %v3526_v7 }
 0x122   : > { %3529 = vmatpush3.bf16.msra.mxu1 %v3526_v7  ;;  %v3591_v7 = vpack.c.bf16 %v2824_v3, %v2823_v2 }
 0x123   : > { %3531 = vmatprep.subr.bf16.mxu1 %v3530_v10 }
 0x126   : > { %3533 = vmatpush3.bf16.msra.mxu1 %v3530_v10  ;;  %v3582_v10 = vpack.c.bf16 %v1619_v6, %v1618_v5 }
 0x127   : > { %3535 = vmatprep.subr.bf16.mxu1 %v3534_v13 }
 0x129   : > { %3178 = vmatmul.mubr.msk.f32.vlgmr.msra.gmra.mrb[2].mxu1 %vm701_vm1, %v4053_v43 }
 0x12a   : > { %3537 = vmatpush3.bf16.msra.mxu1 %v3534_v13  ;;  %3196 = vmatprep.mubr.msk.f32.mxu1 %vm701_vm1, %v683_v50  ;;  %v2829_v13 = vld [vmem:[%s4598_s6 + $0x48] sm:$0xff] }
 0x12b   : > { %3539 = vmatprep.subr.bf16.mxu1 %v3538_v16 }
 0x12e   : > { %3541 = vmatpush3.bf16.msra.mxu1 %v3538_v16  ;;  %v3597_v16 = vpack.c.bf16 %v2829_v13, %v2828_v12  ;;  %v2260_v12 = vld [vmem:[%s4601_s9 + $0x8] sm:$0xff] }
 0x12f   : > { %3543 = vmatprep.subr.bf16.mxu1 %v3542_v19 }
 0x132   : > { %3545 = vmatpush3.bf16.msra.mxu1 %v3542_v19  ;;  %v2831_v19 = vld [vmem:[%s4598_s6 + $0x58] sm:$0xff] }
 0x133   : > { %3547 = vmatprep.subr.bf16.mxu1 %v3546_v22 }
 0x136   : > { %3549 = vmatpush3.bf16.msra.mxu1 %v3546_v22 }
 0x137   : > { %3566 = vmatprep.subr.bf16.mxu1 %v3833_v23 }
 0x139   : > { %3197 = vmatmul.mubr.msk.f32.vlgmr.msra.gmra.mrb[0].mxu1 %vm701_vm1, %v4061_v48  ;;  %v1612_v48 = vld [vmem:[%s4598_s6] sm:$0xff] }
 0x13a   : > { %3222 = vmatprep.mubr.msk.f32.mxu1 %vm3834_vm2, %v3835_v24  ;;  %v3573_v55 = vpack.c.bf16 %v1613_v49, %v1612_v48 }
 0x1d4   : > { %v3217_v25 = vpop.f32.mrb[6].mxu0 }
 0x1d5   : > { %v1222_v26 = vpop.f32.mrb[7].mxu0 }
 0x1fc   : > { %v3179_v28 = vpop.f32.mrb[2].mxu1 }
 0x1fd   : > { %v3700_v29 = vadd.f32 %v3179_v28, %v2758_v27  ;;  %v1044_v30 = vpop.f32.mrb[3].mxu1  ;;  %v3612_v28 = vpack.c.bf16 %v2840_v21, %v2839_v20  ;;  %v2263_v20 = vld [vmem:[%s4601_s9 + $0x20] sm:$0xff]  ;;  %v2264_v21 = vld [vmem:[%s4601_s9 + $0x28] sm:$0xff] }
 0x1fe   : > { %v3702_v31 = vadd.f32 %v2758_v27, %v1044_v30 }
 0x1ff   : > { %v3701_v32 = vadd.f32 %v3700_v29, %v3217_v25  ;;  %v2832_v29 = vld [vmem:[%s4598_s6 + $0x60] sm:$0xff] }
 0x200   : > { %v3703_v33 = vadd.f32 %v3702_v31, %v1222_v26  ;;  %v2833_v31 = vld [vmem:[%s4598_s6 + $0x68] sm:$0xff] }
 0x20c   : > { %v3198_v34 = vpop.f32.mrb[0].mxu1 }
 0x20d   : > { %v3698_v35 = vadd.f32 %v3198_v34, %v2758_v27  ;;  %v1136_v36 = vpop.f32.mrb[1].mxu1 }
 0x20e   : > { %v3699_v37 = vadd.f32 %v2758_v27, %v1136_v36  ;;  %v3600_v27 = vpack.c.bf16 %v2831_v19, %v2830_v18  ;;  %v3603_v36 = vpack.c.bf16 %v2833_v31, %v2832_v29  ;;  %v2262_v18 = vld [vmem:[%s4601_s9 + $0x18] sm:$0xff]  ;;  %v2592_v29 = vld [vmem:[%s4603_s11 + $0x8] sm:$0xff]  ;;  %v2868_v31 = vld [vmem:[%s4601_s9 + $0x40] sm:$0xff] }
 0x20f   : > { %v1234_v38 = vmax.f32 %v3698_v35, %v3701_v32  ;;  %v2841_v32 = vld [vmem:[%s4598_s6 + $0x120] sm:$0xff] }
 0x210   : > { %v1233_v39 = vmax.f32 %v3699_v37, %v3703_v33  ;;  %v2842_v33 = vld [vmem:[%s4598_s6 + $0x128] sm:$0xff] }
 0x211   : > { %v3615_v37 = vpack.c.bf16 %v2842_v33, %v2841_v32  ;;  %v2869_v32 = vld [vmem:[%s4601_s9 + $0x48] sm:$0xff] }
 0x212   : > { %v3567_v40 = vpack.c.bf16 %v1234_v38, %v1233_v39  ;;  %v2834_v38 = vld [vmem:[%s4598_s6 + $0x70] sm:$0xff]  ;;  %v2835_v39 = vld [vmem:[%s4598_s6 + $0x78] sm:$0xff] }
 0x214   : > { %3568 = vmatpush3.bf16.msra.mxu1 %v3567_v40  ;;  %3571 = vmatpush3.bf16.msra.mxu0 %v3567_v40  ;;  %v2843_v40 = vld [vmem:[%s4598_s6 + $0x130] sm:$0xff] }
 0x215   : > { %3232 = vmatprep.subr.mxu1 %v3835_v24  ;;  %3237 = vmatprep.subr.mxu0 %v3835_v24 }
 0x217   : > { %3223 = vmatmul.mubr.msk.f32.vlgmr.msra.gmra.mrb[4].mxu1 %vm442_vm0, %v1235_v41  ;;  %3230 = vmatmul.mubr.msk.f32.vlgmr.msra.gmra.mrb[8].mxu0 %vm442_vm0, %v2810_v42  ;;  %v2844_v41 = vld [vmem:[%s4598_s6 + $0x138] sm:$0xff]  ;;  %v3606_v42 = vpack.c.bf16 %v2835_v39, %v2834_v38  ;;  %v3657_v38 = vpack.c.bf16 %v2869_v32, %v2868_v31 }
 0x218   : > { %3234 = vmatprep.mubr.msk.f32.mxu1 %vm3834_vm2, %v3835_v24  ;;  %3239 = vmatprep.mubr.msk.f32.mxu0 %vm3834_vm2, %v3835_v24 }
 0x2ea   : > { %v1305_v43 = vpop.f32.mrb[4].mxu1  ;;  %v1380_v44 = vpop.f32.mrb[8].mxu0 }
 0x2eb   : > { %v1384_v45 = vmax.f32 %v1305_v43, %v1380_v44  ;;  %v3224_v46 = vpop.f32.mrb[5].mxu1  ;;  %v3231_v47 = vpop.f32.mrb[9].mxu0  ;;  %v3618_v43 = vpack.c.bf16 %v2844_v41, %v2843_v40  ;;  %v2846_v44 = vld [vmem:[%s4598_s6 + $0x80] sm:$0xff]  ;;  %v2870_v40 = vld [vmem:[%s4601_s9 + $0x50] sm:$0xff]  ;;  %v2871_v41 = vld [vmem:[%s4601_s9 + $0x58] sm:$0xff] }
 0x2ec   : > { %v2855_v46 = vld [vmem:[%s4598_s6 + $0x140] sm:$0xff]  ;;  %v2856_v47 = vld [vmem:[%s4598_s6 + $0x148] sm:$0xff] }
 0x2ed   : > { %v1385_v50 = vmax.f32 %v1384_v45, 0.0  ;;  %v2847_v45 = vld [vmem:[%s4598_s6 + $0x88] sm:$0xff]  ;;  %v3633_v49 = vpack.c.bf16 %v2856_v47, %v2855_v46  ;;  %v2874_v46 = vld [vmem:[%s4601_s9 + $0x70] sm:$0xff]  ;;  %v2875_v47 = vld [vmem:[%s4601_s9 + $0x78] sm:$0xff] }
 0x2ee   : > { %v3621_v48 = vpack.c.bf16 %v2847_v45, %v2846_v44  ;;  %v2873_v44 = vld [vmem:[%s4601_s9 + $0x68] sm:$0xff] }
 0x2ef   : > { %3233 = vmatpush3.msra.mxu1 %v1385_v50  ;;  %3238 = vmatpush3.msra.mxu0 %v1385_v50 }
 0x2f0   : > { %3235 = vmatmul.mubr.msk.f32.vlgmr.msra.gmra.mrb[6].mxu1 %vm1387_vm3, %v1386_v51  ;;  %3242 = vmatprep.subr.mxu1 %v3835_v24  ;;  %v2849_v51 = vld [vmem:[%s4598_s6 + $0x98] sm:$0xff] }
 0x2f1   : > { %3243 = vmatpush3.msra.mxu1 %v1385_v50  ;;  %3240 = vmatmul.mubr.msk.f32.vlgmr.msra.gmra.mrb[10].mxu0 %vm1387_vm3, %v2813_v52  ;;  %v2848_v50 = vld [vmem:[%s4598_s6 + $0x90] sm:$0xff] }
 0x2f2   : > { %3244 = vmatprep.mubr.msk.f32.mxu1 %vm3834_vm2, %v3835_v24  ;;  %3572 = vmatprep.subr.bf16.mxu0 %v3833_v23  ;;  %v2857_v52 = vld [vmem:[%s4598_s6 + $0x150] sm:$0xff]  ;;  %v3624_v54 = vpack.c.bf16 %v2849_v51, %v2848_v50  ;;  %v2878_v50 = vld [vmem:[%s4601_s9 + $0x88] sm:$0xff] }
 0x2f3   : > { %3584 = vmatprep.subr.bf16.mxu1 %v3833_v23  ;;  %3574 = vmatpush3.bf16.msra.mxu0 %v3573_v55  ;;  %v3636_v55 = vpack.c.bf16 %v2858_v53, %v2857_v52  ;;  %v2879_v53 = vld [vmem:[%s4601_s9 + $0x90] sm:$0xff] }
 0x2f4   : > { %3245 = vmatmul.mubr.msk.f32.vlgmr.msra.gmra.mrb[8].mxu1 %vm1387_vm3, %v2815_v58  ;;  %3575 = vmatprep.subr.bf16.mxu0 %v3833_v23  ;;  %v2859_v58 = vld [vmem:[%s4598_s6 + $0x160] sm:$0xff] }
 0x2f5   : > { %3586 = vmatpush3.bf16.msra.mxu1 %v3585_v59  ;;  %3263 = vmatprep.mubr.msk.f32.mxu0 %vm3834_vm2, %v3835_v24  ;;  %v2860_v59 = vld [vmem:[%s4598_s6 + $0x168] sm:$0xff] }
 0x2f6   : > { %3587 = vmatprep.subr.bf16.mxu1 %v3833_v23  ;;  %3282 = vmatprep.mubr.msk.f32.mxu1 %vm3834_vm2, %v3835_v24  ;;  %v3639_v61 = vpack.c.bf16 %v2860_v59, %v2859_v58  ;;  %v3675_v58 = vpack.c.bf16 %v2882_v57, %v2881_v56  ;;  %v2883_v59 = vld [vmem:[%s4601_s9 + $0xb0] sm:$0xff] }
 0x2f7   : > { %3577 = vmatpush3.bf16.msra.mxu0 %v3576_v62  ;;  %v2852_v62 = vld [vmem:[%s4598_s6 + $0xb0] sm:$0xff] }
 0x2f8   : > { %3578 = vmatprep.subr.bf16.mxu0 %v3833_v23  ;;  %v3630_v2 = vpack.c.bf16 %v2853_v63, %v2852_v62  ;;  %v2886_v62 = vld [vmem:[%s4601_s9 + $0xc0] sm:$0xff]  ;;  %v2887_v63 = vld [vmem:[%s4601_s9 + $0xc8] sm:$0xff] }
 0x2f9   : > { %3589 = vmatpush3.bf16.msra.mxu1 %v3588_v1  ;;  %v2862_v1 = vld [vmem:[%s4598_s6 + $0x178] sm:$0xff] }
 0x2fa   : > { %3590 = vmatprep.subr.bf16.mxu1 %v3833_v23  ;;  %v3642_v3 = vpack.c.bf16 %v2862_v1, %v2861_v0  ;;  %v3681_v0 = vpack.c.bf16 %v2887_v63, %v2886_v62 }
 0x2fb   : > { %3580 = vmatpush3.bf16.msra.mxu0 %v3579_v4  ;;  %v2818_v4 = vld [vmem:[%s4599_s7] ss:$0 sm:$0xff] }
 0x2fc   : > { %3581 = vmatprep.subr.bf16.mxu0 %v3833_v23 }
 0x2fd   : > { %3592 = vmatpush3.bf16.msra.mxu1 %v3591_v7 }
 0x2fe   : > { %3593 = vmatprep.subr.bf16.mxu1 %v3833_v23 }
 0x2ff   : > { %3583 = vmatpush3.bf16.msra.mxu0 %v3582_v10 }
 0x300   : > { %3596 = vmatprep.subr.bf16.mxu0 %v3833_v23 }
 0x301   : > { %3595 = vmatpush3.bf16.msra.mxu1 %v3594_v11  ;;  %v2259_v11 = vld [vmem:[%s4601_s9] sm:$0xff] }
 0x302   : > { %3608 = vmatprep.subr.bf16.mxu1 %v3833_v23 }
 0x3c3   : > { %v1457_v22 = vpop.f32.mrb[6].mxu1 }
 0x3c4   : > { %v3236_v25 = vpop.f32.mrb[7].mxu1  ;;  %3264 = vmatmul.mubr.msk.f32.vlgmr.msra.gmra.mrb[12].mxu0 %vm701_vm1, %v1457_v22  ;;  %3283 = vmatmul.mubr.msk.f32.vlgmr.msra.gmra.mrb[10].mxu1 %vm701_vm1, %v1457_v22  ;;  %v1532_v26 = vpop.f32.mrb[10].mxu0  ;;  %v3651_v22 = vpack.c.bf16 %v2264_v21, %v2263_v20 }
 0x3c5   : > { %3598 = vmatpush3.bf16.msra.mxu0 %v3597_v16  ;;  %3610 = vmatpush3.bf16.msra.mxu1 %v3609_v17  ;;  %v3241_v30 = vpop.f32.mrb[11].mxu0  ;;  %v3645_v16 = vpack.c.bf16 %v2260_v12, %v2259_v11  ;;  %v2261_v17 = vld [vmem:[%s4601_s9 + $0x10] sm:$0xff]  ;;  %v2594_v12 = vld [vmem:[%s4603_s11 + $0x18] sm:$0xff] }
 0x3c6   : > { %3599 = vmatprep.subr.bf16.mxu0 %v3833_v23  ;;  %3611 = vmatprep.subr.bf16.mxu1 %v3833_v23  ;;  %v3648_v19 = vpack.c.bf16 %v2262_v18, %v2261_v17  ;;  %v2265_v25 = vld [vmem:[%s4601_s9 + $0x30] sm:$0xff]  ;;  %v2595_v18 = vld [vmem:[%s4604_s12] sm:$0x1] }
 0x3c7   : > { %3301 = vmatprep.mubr.msk.f32.mxu0 %vm3834_vm2, %v3835_v24  ;;  %3320 = vmatprep.mubr.msk.f32.mxu1 %vm3834_vm2, %v3835_v24  ;;  %v4292_v34 = vpop.f32.mrb[8].mxu1  ;;  %v2593_v11 = vld [vmem:[%s4603_s11 + $0x10] sm:$0xff] }
 0x3c8   : > { %v3246_v35 = vpop.f32.mrb[9].mxu1 }
 0x3c9   : > { %3601 = vmatpush3.bf16.msra.mxu0 %v3600_v27  ;;  %3613 = vmatpush3.bf16.msra.mxu1 %v3612_v28  ;;  %v2591_v28 = vld [vmem:[%s4603_s11] sm:$0xff] }
 0x3ca   : > { %3602 = vmatprep.subr.bf16.mxu0 %v3833_v23  ;;  %3614 = vmatprep.subr.bf16.mxu1 %v3833_v23  ;;  %v3693_v30 = vpack.c.bf16 %v2592_v29, %v2591_v28 }
 0x3cd   : > { %3604 = vmatpush3.bf16.msra.mxu0 %v3603_v36  ;;  %3616 = vmatpush3.bf16.msra.mxu1 %v3615_v37 }
 0x3ce   : > { %3605 = vmatprep.subr.bf16.mxu0 %v3833_v23  ;;  %3617 = vmatprep.subr.bf16.mxu1 %v3833_v23 }
 0x3d1   : > { %3607 = vmatpush3.bf16.msra.mxu0 %v3606_v42  ;;  %3619 = vmatpush3.bf16.msra.mxu1 %v3618_v43  ;;  %v3660_v42 = vpack.c.bf16 %v2871_v41, %v2870_v40  ;;  %v2872_v43 = vld [vmem:[%s4601_s9 + $0x60] sm:$0xff] }
 0x3d2   : > { %3620 = vmatprep.subr.bf16.mxu0 %v3833_v23  ;;  %3632 = vmatprep.subr.bf16.mxu1 %v3833_v23  ;;  %v3663_v45 = vpack.c.bf16 %v2873_v44, %v2872_v43 }
 0x3d4   : > { %3302 = vmatmul.mubr.msk.f32.vlgmr.msra.gmra.mrb[12].mxu0 %vm701_vm1, %v1532_v26  ;;  %3321 = vmatmul.mubr.msk.f32.vlgmr.msra.gmra.mrb[10].mxu1 %vm701_vm1, %v1532_v26  ;;  %v2266_v26 = vld [vmem:[%s4601_s9 + $0x38] sm:$0xff] }
 0x3d5   : > { %3622 = vmatpush3.bf16.msra.mxu0 %v3621_v48  ;;  %3634 = vmatpush3.bf16.msra.mxu1 %v3633_v49  ;;  %v3654_v27 = vpack.c.bf16 %v2266_v26, %v2265_v25  ;;  %v3666_v48 = vpack.c.bf16 %v2875_v47, %v2874_v46  ;;  %v2877_v49 = vld [vmem:[%s4601_s9 + $0x80] sm:$0xff] }
 0x3d6   : > { %3623 = vmatprep.subr.bf16.mxu0 %v3833_v23  ;;  %3635 = vmatprep.subr.bf16.mxu1 %v3833_v23  ;;  %v3669_v51 = vpack.c.bf16 %v2878_v50, %v2877_v49 }
 0x3d7   : > { %3339 = vmatprep.mubr.msk.f32.mxu0 %vm3834_vm2, %v3835_v24  ;;  %3358 = vmatprep.mubr.msk.f32.mxu1 %vm3834_vm2, %v3835_v24 }
 0x3d9   : > { %3625 = vmatpush3.bf16.msra.mxu0 %v3624_v54  ;;  %3637 = vmatpush3.bf16.msra.mxu1 %v3636_v55  ;;  %v2880_v54 = vld [vmem:[%s4601_s9 + $0x98] sm:$0xff] }
 0x3da   : > { %3626 = vmatprep.subr.bf16.mxu0 %v3833_v23  ;;  %3638 = vmatprep.subr.bf16.mxu1 %v3833_v23  ;;  %v3672_v55 = vpack.c.bf16 %v2880_v54, %v2879_v53 }
 0x3dd   : > { %3628 = vmatpush3.bf16.msra.mxu0 %v3627_v60  ;;  %3640 = vmatpush3.bf16.msra.mxu1 %v3639_v61  ;;  %v2884_v60 = vld [vmem:[%s4601_s9 + $0xb8] sm:$0xff] }
 0x3de   : > { %3629 = vmatprep.subr.bf16.mxu0 %v3833_v23  ;;  %3641 = vmatprep.subr.bf16.mxu1 %v3833_v23  ;;  %v3678_v61 = vpack.c.bf16 %v2884_v60, %v2883_v59 }
 0x3e1   : > { %3631 = vmatpush3.bf16.msra.mxu0 %v3630_v2  ;;  %3643 = vmatpush3.bf16.msra.mxu1 %v3642_v3  ;;  %v2888_v2 = vld [vmem:[%s4601_s9 + $0xd0] sm:$0xff]  ;;  %v2889_v3 = vld [vmem:[%s4601_s9 + $0xd8] sm:$0xff] }
 0x3e2   : > { %3361 = vmatprep.subr.mxu0 %v3835_v24  ;;  %3366 = vmatprep.subr.mxu1 %v3835_v24 }
 0x3e4   : > { %3340 = vmatmul.mubr.msk.f32.vlgmr.msra.gmra.mrb[12].mxu0 %vm701_vm1, %v4292_v34  ;;  %3359 = vmatmul.mubr.msk.f32.vlgmr.msra.gmra.mrb[10].mxu1 %vm701_vm1, %v4292_v34 }
 0x3e5   : > { %3363 = vmatprep.mubr.msk.f32.mxu0 %vm3834_vm2, %v3835_v24  ;;  %3368 = vmatprep.mubr.msk.f32.mxu1 %vm3834_vm2, %v3835_v24 }
 0x4b7   : > { %v2021_v5 = vpop.f32.mrb[12].mxu0  ;;  %v2101_v6 = vpop.f32.mrb[10].mxu1 }
 0x4b8   : > { %v3704_v7 = vadd.f32 %v2818_v4, %v2021_v5  ;;  %v3705_v8 = vadd.f32 %v2818_v4, %v2101_v6  ;;  %v3341_v9 = vpop.f32.mrb[13].mxu0  ;;  %v3360_v10 = vpop.f32.mrb[11].mxu1  ;;  %v3684_v4 = vpack.c.bf16 %v2889_v3, %v2888_v2  ;;  %v2890_v5 = vld [vmem:[%s4601_s9 + $0xe0] sm:$0xff]  ;;  %v2891_v6 = vld [vmem:[%s4601_s9 + $0xe8] sm:$0xff] }
 0x4ba   : > { %v2106_v13 = vmax.f32 %v3704_v7, %v3705_v8  ;;  %v3687_v7 = vpack.c.bf16 %v2891_v6, %v2890_v5  ;;  %v2892_v8 = vld [vmem:[%s4601_s9 + $0xf0] sm:$0xff] }
 0x4bc   : > { %3362 = vmatpush3.msra.mxu0 %v2106_v13  ;;  %3367 = vmatpush3.msra.mxu1 %v2106_v13  ;;  %v3696_v13 = vpack.c.bf16 %v2594_v12, %v2593_v11 }
 0x4bd   : > { %3364 = vmatmul.mubr.msk.f32.vlgmr.msra.gmra.mrb[14].mxu0 %vm1387_vm3, %v2107_v14  ;;  %3369 = vmatmul.mubr.msk.f32.vlgmr.msra.gmra.mrb[12].mxu1 %vm1387_vm3, %v2865_v15 }
 0x4be   : > { %3644 = vmatprep.subr.bf16.mxu0 %v3833_v23  ;;  %3387 = vmatprep.mubr.msk.f32.mxu0 %vm3834_vm2, %v3835_v24 }
 0x4bf   : > { %3646 = vmatpush3.bf16.msra.mxu0 %v3645_v16  ;;  %3692 = vmatprep.subr.bf16.mxu1 %v3833_v23 }
 0x4c0   : > { %3647 = vmatprep.subr.bf16.mxu0 %v3833_v23  ;;  %3455 = vmatprep.mubr.msk.f32.mxu1 %vm3834_vm2, %v3835_v24 }
 0x4c1   : > { %3694 = vmatpush3.bf16.msra.mxu1 %v3693_v30 }
 0x4c2   : > { %3695 = vmatprep.subr.bf16.mxu1 %v3833_v23 }
 0x4c3   : > { %3649 = vmatpush3.bf16.msra.mxu0 %v3648_v19 }
 0x4c4   : > { %3650 = vmatprep.subr.bf16.mxu0 %v3833_v23 }
 0x4c5   : > { %3697 = vmatpush3.bf16.msra.mxu1 %v3696_v13 }
 0x4c7   : > { %3652 = vmatpush3.bf16.msra.mxu0 %v3651_v22 }
 0x4c8   : > { %3653 = vmatprep.subr.bf16.mxu0 %v3833_v23 }
 0x4cb   : > { %3655 = vmatpush3.bf16.msra.mxu0 %v3654_v27 }
 0x4cc   : > { %3656 = vmatprep.subr.bf16.mxu0 %v3833_v23 }
 0x590   : > { %v2177_v33 = vpop.f32.mrb[14].mxu0  ;;  %v2252_v34 = vpop.f32.mrb[12].mxu1 }
 0x591   : > { %v2256_v35 = vmax.f32 %v2177_v33, %v2252_v34  ;;  %v3365_v36 = vpop.f32.mrb[15].mxu0  ;;  %v3370_v37 = vpop.f32.mrb[13].mxu1 }
 0x593   : > { %v4440_v39 = vmax.f32 %v2256_v35, 0.0 }
 0x595   : > { %3388 = vmatmul.mubr.msk.f32.vlgmr.msra.gmra.mrb[16].mxu0 %vm701_vm1, %v4440_v39  ;;  %v2350_v52 = vrot.slane %v4440_v39, 1  ;;  %v2433_v1 = vrot.slane %v4440_v39, 2  ;;  %v2516_v10 = vrot.slane %v4440_v39, 3 }
 0x596   : > { %3658 = vmatpush3.bf16.msra.mxu0 %v3657_v38  ;;  %3406 = vmatprep.mubr.msk.f32.mxu0 %vm3834_vm2, %v3835_v24 }
 0x597   : > { %3659 = vmatprep.subr.bf16.mxu0 %v3833_v23 }
 0x59a   : > { %3661 = vmatpush3.bf16.msra.mxu0 %v3660_v42 }
 0x59b   : > { %3662 = vmatprep.subr.bf16.mxu0 %v3833_v23 }
 0x59e   : > { %3664 = vmatpush3.bf16.msra.mxu0 %v3663_v45 }
 0x59f   : > { %3665 = vmatprep.subr.bf16.mxu0 %v3833_v23 }
 0x5a2   : > { %3667 = vmatpush3.bf16.msra.mxu0 %v3666_v48 }
 0x5a3   : > { %3668 = vmatprep.subr.bf16.mxu0 %v3833_v23 }
 0x5a5   : > { %3407 = vmatmul.mubr.msk.f32.vlgmr.msra.gmra.mrb[16].mxu0 %vm701_vm1, %v2350_v52 }
 0x5a6   : > { %3670 = vmatpush3.bf16.msra.mxu0 %v3669_v51  ;;  %3425 = vmatprep.mubr.msk.f32.mxu0 %vm3834_vm2, %v3835_v24 }
 0x5a7   : > { %3671 = vmatprep.subr.bf16.mxu0 %v3833_v23 }
 0x5aa   : > { %3673 = vmatpush3.bf16.msra.mxu0 %v3672_v55 }
 0x5ab   : > { %3674 = vmatprep.subr.bf16.mxu0 %v3833_v23 }
 0x5ae   : > { %3676 = vmatpush3.bf16.msra.mxu0 %v3675_v58 }
 0x5af   : > { %3677 = vmatprep.subr.bf16.mxu0 %v3833_v23 }
 0x5b2   : > { %3679 = vmatpush3.bf16.msra.mxu0 %v3678_v61 }
 0x5b3   : > { %3680 = vmatprep.subr.bf16.mxu0 %v3833_v23 }
 0x5b5   : > { %3426 = vmatmul.mubr.msk.f32.vlgmr.msra.gmra.mrb[16].mxu0 %vm701_vm1, %v2433_v1 }
 0x5b6   : > { %3682 = vmatpush3.bf16.msra.mxu0 %v3681_v0  ;;  %3444 = vmatprep.mubr.msk.f32.mxu0 %vm3834_vm2, %v3835_v24  ;;  %v2893_v24 = vld [vmem:[%s4601_s9 + $0xf8] sm:$0xff] }
 0x5b7   : > { %3683 = vmatprep.subr.bf16.mxu0 %v3833_v23  ;;  %v3690_v9 = vpack.c.bf16 %v2893_v24, %v2892_v8 }
 0x5ba   : > { %3685 = vmatpush3.bf16.msra.mxu0 %v3684_v4 }
 0x5bb   : > { %3686 = vmatprep.subr.bf16.mxu0 %v3833_v23 }
 0x5be   : > { %3688 = vmatpush3.bf16.msra.mxu0 %v3687_v7 }
 0x5bf   : > { %3689 = vmatprep.subr.bf16.mxu0 %v3833_v23  ;;  %v2258_v23 = vld [vmem:[%s4602_s10] sm:$0x1] }
 0x5c2   : > { %3691 = vmatpush3.bf16.msra.mxu0 %v3690_v9 }
 0x5c5   : > { %3445 = vmatmul.mubr.msk.f32.vlgmr.msra.gmra.mrb[16].mxu0 %vm701_vm1, %v2516_v10 }
 0x698   : > { %v2585_v14 = vpop.f32.mrb[16].mxu0 }
 0x699   : > { %v3706_v15 = vadd.f32 %v2585_v14, %v2258_v23  ;;  %v3446_v16 = vpop.f32.mrb[17].mxu0 }
 0x69b   : > { %v2590_v17 = vmax.f32 %v3706_v15, 0.0 }
 0x69d   : > { %3456 = vmatmul.mubr.msk.f32.vlgmr.msra.gmra.mrb[14].mxu1 %vm2596_vm4, %v2590_v17 }
 0x770   : > { %v2666_v19 = vpop.f32.mrb[14].mxu1 }
 0x771   : > { %v2667_v20 = vadd.f32 %v2666_v19, %v2595_v18  ;;  %v3457_v21 = vpop.f32.mrb[15].mxu1 }
 0x773   : > { %2671 = vst.msk [vmem:[%s432_s15] sm:$0x1] %vm2670_vm5, %v2667_v20 }
 0x774   : > { %3782 = shalt.err (!%p3779_p3)
}
 0x775   : > { %s3783_s21 = scalar_lea.hbm %s4550_s14, 16  ;;  %s3787_s15 = scalar_lea.hbm %s4605_s13, 32 }
 0x776   : > { %p3784_p4 = scmp.ne.s32.totalorder %s4550_s14, %s3783_s21  ;;  %p3788_p9 = scmp.lt.u32.totalorder %s4550_s14, %s4605_s13 }
 0x777   : > { %p3789_p10 = scmp.lt.u32.totalorder %s3787_s15, %s3783_s21  ;;  %p3791_p12 = scmp.lt.u32.totalorder %s3783_s21, %s4550_s14 }
 0x778   : > { %p3785_p7 = pnand %p3784_p4, %p3945_p5 }
 0x779   : > { %p3790_p11 = por %p3789_p10, %p3788_p9 }
 0x77a   : > { %p3786_p8 = pneg %p3785_p7 }
 0x77b   : > { %p3792_p13 = por %p3791_p12, %p3790_p11 }
 0x77d   : > { %p3793_p0 = pnand %p3792_p13, %p3786_p8 }
 0x77f   : > { %3796 = shalt.err (!%p3793_p0)
}
 0x780   : > { %3727 = dma.vmem_to_hbm [thread:$0]  (%p3945_p5), %s4552_s17, 16, %s4550_s14, %s2673_s19  }
 0x781 PF: > { %p3733_p1 = scmp.ge.s32.totalorder %s3831_s28, 2  ;;  %s2697_s29 = sand.u32 1, %s3819_s25  }
 0x782   : > { %s2698_s20 = scalar_lea.sflag [#allocation3], %s2697_s29 }
 0x783   : > { %p3730_p2 = pnand %p3733_p1, %p3949_p6 }
 0x785   : > { %3814 = dma.done.wait (!%p3730_p2), %s2698_s20, 16  }
 0x786   : > { %3816 = vsyncadd (!%p3730_p2), %s2698_s20, 4294967280  ;;  %s4617_s28 = sld [smem:[#allocation6_spill]]  ;;  %s4618_s23 = sld [smem:[#allocation5_spill]] }
 0x787   : > { %s4619_s27 = sld [smem:[#allocation7_spill]]  ;;  %s4620_s25 = smov %s3823_s26 }
 0x78c   : > { %p23_p3 = scmp.ge.s32.totalorder %s4617_s28, 4   ;;  %s4621_s26 = smov %s4618_s23 }
 0x78e   :  { %25 = sbr.rel (!%p23_p3) target bundleno = 3 (0x3), region = 126 }
 0x795   :  { %2702 = vsyncpa [#allocation3], 1 }
 0x796   :  { %2704 = vsyncpa [#allocation3 + $0x1], 1 }

</bundles_post_ra>
